<compile_context>
chip_gen: v7x
topology: tpu7x:2x2x1
jax: 0.10.0
libtpu: 0.0.40
codegen_flags: <defaults>
</compile_context>

<pallas_src>
import jax
import jax.numpy as jnp
from jax.experimental import pallas as pl
from jax.experimental.pallas import tpu as pltpu


def _upconv_fused_kernel(x_ref, w_ref, o_ref, stat_ref, xpad_ref):
    # x_ref   : (1, H, W, Cin)   original-resolution input (one batch element), f32
    # w_ref   : (4*Cout, 9*Cin)  phase-collapsed weights (bf16 or f32)
    # o_ref   : (1, 4*Cout, HW)  conv output, phase-major rows, lane-dense HW
    # stat_ref: (1, 4*Cout, 2)   per-row [sum, sum_of_squares] partial BN stats
    # xpad_ref: (H+2, W+2, Cin)  VMEM scratch: zero-padded original image, f32
    H = x_ref.shape[1]
    W = x_ref.shape[2]
    Cin = x_ref.shape[3]
    HW = H * W

    # Zero only the 1-pixel border; the interior is fully overwritten below,
    # so no full-buffer store per grid step (review: pad-zero fix).
    zrow = jnp.zeros((1, W + 2, Cin), jnp.float32)
    zcol = jnp.zeros((H + 2, 1, Cin), jnp.float32)
    xpad_ref[0:1, :, :] = zrow
    xpad_ref[H + 1:H + 2, :, :] = zrow
    xpad_ref[:, 0:1, :] = zcol
    xpad_ref[:, W + 1:W + 2, :] = zcol
    xpad_ref[1:H + 1, 1:W + 1, :] = x_ref[0]

    xp = xpad_ref[...]                                   # (H+2, W+2, Cin)

    # 9-tap im2col patch of the ORIGINAL image, shared by all 4 phases.
    # Column order = (dr*3 + dc)*Cin + cin, matching the weight layout.
    taps = [xp[dr:dr + H, dc:dc + W, :].reshape(HW, Cin)
            for dr in range(3) for dc in range(3)]
    patch = jnp.concatenate(taps, axis=1).astype(w_ref.dtype)   # (HW, 9*Cin)

    # ONE fused MXU matmul: (4*Cout, 9*Cin) x (HW, 9*Cin)^T -> (4*Cout, HW).
    acc = jax.lax.dot_general(
        w_ref[...], patch,
        dimension_numbers=(((1,), (1,)), ((), ())),
        preferred_element_type=jnp.float32)              # (4*Cout, HW) f32

    o_ref[0] = acc                                       # lane-dense store

    # Per-row (phase, channel) partial BN statistics: lane-axis reductions.
    sum_c = jnp.sum(acc, axis=1, keepdims=True)
    sq_c = jnp.sum(acc * acc, axis=1, keepdims=True)
    stat_ref[0] = jnp.concatenate([sum_c, sq_c], axis=1)  # (4*Cout, 2)


def _bn_relu_kernel(y_ref, scale_ref, shift_ref, o_ref):
    # y_ref: (1, 4*Cout, HW); scale/shift: (4*Cout, 1) per-(phase,channel) row.
    o_ref[0] = jnp.maximum(y_ref[0] * scale_ref[...] + shift_ref[...], 0.0)


def up_conv_forward(x_nchw, w_oihw, bias, gamma, beta, *, scale_factor=2,
                    eps=1e-5, matmul_dtype=jnp.bfloat16):
    """Forward pass of up_conv; input/output are NCHW like the PyTorch module."""
    # TODO(synk): kernel is specialized to the module default scale_factor=2
    # (nearest upsample); other scale factors would need a different phase map.
    assert scale_factor == 2
    del bias  # Cancels exactly under training-mode BN (only affects the
              # never-reported running stats), so it is dropped (review item).
    N, Cin, H, W = x_nchw.shape
    Cout = w_oihw.shape[0]
    Hu, Wu = 2 * H, 2 * W
    HW = H * W

    x_nhwc = jnp.transpose(x_nchw, (0, 2, 3, 1)).astype(jnp.float32)

    # Collapse (nearest-2x upsample o 3x3 conv pad=1) into 4 phase kernels over
    # the ORIGINAL padded image's 3x3 stencil (tiny weight-only prep).
    # RMAP[parity][dy] = stencil row dr (x-offset dr-1) that conv tap dy hits.
    RMAP = ((0, 1, 1), (1, 1, 2))
    w_hw = jnp.transpose(w_oihw.astype(jnp.float32), (0, 2, 3, 1))  # (Cout,3,3,Cin)
    w_rows = []
    for a in (0, 1):
        for b in (0, 1):
            we = jnp.zeros((Cout, 3, 3, Cin), jnp.float32)
            for dy in range(3):
                for dx in range(3):
                    we = we.at[:, RMAP[a][dy], RMAP[b][dx], :].add(w_hw[:, dy, dx, :])
            w_rows.append(we.reshape(Cout, 9 * Cin))
    w_eff = jnp.concatenate(w_rows, axis=0).astype(matmul_dtype)  # (4*Cout, 9*Cin)

    # --- Pallas kernel 1: fused upsample+conv (subpixel, ONE matmul) + BN
    #     partial statistics; grid over batch, "parallel" for megacore. ---
    conv_out, stats = pl.pallas_call(
        _upconv_fused_kernel,
        out_shape=(jax.ShapeDtypeStruct((N, 4 * Cout, HW), jnp.float32),
                   jax.ShapeDtypeStruct((N, 4 * Cout, 2), jnp.float32)),
        grid=(N,),
        in_specs=[
            pl.BlockSpec((1, H, W, Cin), lambda n: (n, 0, 0, 0)),
            pl.BlockSpec((4 * Cout, 9 * Cin), lambda n: (0, 0)),
        ],
        out_specs=(
            pl.BlockSpec((1, 4 * Cout, HW), lambda n: (n, 0, 0)),
            pl.BlockSpec((1, 4 * Cout, 2), lambda n: (n, 0, 0)),
        ),
        scratch_shapes=[pltpu.VMEM((H + 2, W + 2, Cin), jnp.float32)],
        compiler_params=pltpu.CompilerParams(
            dimension_semantics=("parallel",)),
    )(x_nhwc, w_eff)

    # Tiny (Cout,)-sized batch-stat math in the wrapper (biased variance, as in
    # PyTorch training-mode BN normalization).
    count = jnp.float32(N * Hu * Wu)
    s = stats.reshape(N, 4, Cout, 2)
    ch_sum = jnp.sum(s[..., 0], axis=(0, 1))             # (Cout,)
    ch_sq = jnp.sum(s[..., 1], axis=(0, 1))
    mean = ch_sum / count
    var = jnp.maximum(ch_sq / count - mean * mean, 0.0)
    inv = jax.lax.rsqrt(var + eps)
    g = gamma.astype(jnp.float32)
    scale_c = g * inv
    shift_c = beta.astype(jnp.float32) - mean * scale_c
    scale = jnp.tile(scale_c, 4).reshape(4 * Cout, 1)     # phase-major rows
    shift = jnp.tile(shift_c, 4).reshape(4 * Cout, 1)
    # TODO(synk): running_mean/running_var buffer updates of nn.BatchNorm2d are
    # not emitted (they do not affect the module's forward output).

    # --- Pallas kernel 2: elementwise BN apply + ReLU on big lane-dense blocks
    #     (all 4 phases folded into one block per batch element). ---
    bn_out = pl.pallas_call(
        _bn_relu_kernel,
        out_shape=jax.ShapeDtypeStruct((N, 4 * Cout, HW), jnp.float32),
        grid=(N,),
        in_specs=[
            pl.BlockSpec((1, 4 * Cout, HW), lambda n: (n, 0, 0)),
            pl.BlockSpec((4 * Cout, 1), lambda n: (0, 0)),
            pl.BlockSpec((4 * Cout, 1), lambda n: (0, 0)),
        ],
        out_specs=pl.BlockSpec((1, 4 * Cout, HW), lambda n: (n, 0, 0)),
        compiler_params=pltpu.CompilerParams(dimension_semantics=("parallel",)),
    )(conv_out, scale, shift)

    # Phase de-interleave back to NCHW: out[n,c,2i+a,2j+b] = phase(a,b)[n,c,i,j].
    out = bn_out.reshape(N, 2, 2, Cout, H, W)
    out = jnp.transpose(out, (0, 3, 4, 1, 5, 2)).reshape(N, Cout, Hu, Wu)
    return out


def _reference_up_conv(x, w, b, gamma, beta, eps=1e-5):
    """Pure-JAX reference of the PyTorch module forward (fp32)."""
    xu = jnp.repeat(jnp.repeat(x, 2, axis=2), 2, axis=3)          # nearest 2x
    y = jax.lax.conv_general_dilated(
        xu, w, window_strides=(1, 1), padding=((1, 1), (1, 1)),
        dimension_numbers=("NCHW", "OIHW", "NCHW"))
    y = y + b[None, :, None, None]
    mean = jnp.mean(y, axis=(0, 2, 3), keepdims=True)
    var = jnp.mean((y - mean) ** 2, axis=(0, 2, 3), keepdims=True)  # biased
    y = (y - mean) * jax.lax.rsqrt(var + eps)
    y = y * gamma[None, :, None, None] + beta[None, :, None, None]
    return jnp.maximum(y, 0.0)


if __name__ == "__main__":
    # Small deterministic config consistent with the module: up_conv(4, 8).
    N, Cin, Cout, H, W = 2, 4, 8, 16, 16
    key = jax.random.PRNGKey(0)
    kx, kw, kb, kg, kbe = jax.random.split(key, 5)

    x = jax.random.normal(kx, (N, Cin, H, W), dtype=jnp.float32)
    w = 0.1 * jax.random.normal(kw, (Cout, Cin, 3, 3), dtype=jnp.float32)
    b = 0.1 * jax.random.normal(kb, (Cout,), dtype=jnp.float32)
    gamma = 1.0 + 0.1 * jax.random.normal(kg, (Cout,), dtype=jnp.float32)
    beta = 0.1 * jax.random.normal(kbe, (Cout,), dtype=jnp.float32)

    ref = _reference_up_conv(x, w, b, gamma, beta)

    # fp32-operand MXU path: tight check of the kernel math itself.
    out_f32 = up_conv_forward(x, w, b, gamma, beta, matmul_dtype=jnp.float32)
    jax.block_until_ready(out_f32)
    assert out_f32.shape == (N, Cout, 2 * H, 2 * W)
    err32 = float(jnp.max(jnp.abs(out_f32 - ref)))
    assert err32 < 2e-3, f"fp32 path max abs err vs reference: {err32}"

    # bf16-operand MXU path (default / fast on v5e-v7x): fp32 accumulation, so
    # the extra error is only bf16 rounding of the matmul operands.
    out_bf16 = up_conv_forward(x, w, b, gamma, beta)
    jax.block_until_ready(out_bf16)
    assert out_bf16.shape == (N, Cout, 2 * H, 2 * W)
    errbf = float(jnp.max(jnp.abs(out_bf16 - ref)))
    assert errbf < 8e-2, f"bf16 path max abs err vs reference: {errbf}"

    print("KERNEL_OK")
</pallas_src>

<mosaic_0001>
module attributes {stable_mosaic.version = 11 : i64} {
  func.func @_upconv_fused_kernel(%arg0: i32, %arg1: memref<1x16x16x4xf32, #tpu.memory_space<vmem>>, %arg2: memref<32x36xf32, #tpu.memory_space<vmem>>, %arg3: memref<1x32x256xf32, #tpu.memory_space<vmem>>, %arg4: memref<1x32x2xf32, #tpu.memory_space<vmem>>, %arg5: memref<18x18x4xf32, #tpu.memory_space<vmem>>) attributes {dimension_semantics = [#tpu.dimension_semantics<parallel>], iteration_bounds = array<i64: 2>, scalar_prefetch = 0 : i64, scratch_operands = 1 : i64, tpu.core_type = #tpu.core_type<tc>, window_params = [{transform_indices = @transform_0, window_bounds = array<i64: 1, 16, 16, 4>}, {pipeline_mode = #tpu.pipeline_mode<synchronous>, transform_indices = @transform_1, window_bounds = array<i64: 32, 36>}, {transform_indices = @transform_2, window_bounds = array<i64: 1, 32, 256>}, {transform_indices = @transform_3, window_bounds = array<i64: 1, 32, 2>}]} {
    %cst = arith.constant 0.000000e+00 : f32
    %0 = vector.broadcast %cst : f32 to vector<1x18x4xf32>
    %cst_0 = arith.constant 0.000000e+00 : f32
    %1 = vector.broadcast %cst_0 : f32 to vector<18x1x4xf32>
    %c0 = arith.constant 0 : index
    %c0_1 = arith.constant 0 : index
    %c0_2 = arith.constant 0 : index
    %2 = vector.load %arg5[%c0, %c0_1, %c0_2] : memref<18x18x4xf32, #tpu.memory_space<vmem>>, vector<1x18x4xf32>
    tpu.vector_store %arg5[%c0, %c0_1, %c0_2], %0 {strides = array<i32>} : memref<18x18x4xf32, #tpu.memory_space<vmem>>, vector<1x18x4xf32>,
    %c17 = arith.constant 17 : index
    %c0_3 = arith.constant 0 : index
    %c0_4 = arith.constant 0 : index
    %3 = vector.load %arg5[%c17, %c0_3, %c0_4] : memref<18x18x4xf32, #tpu.memory_space<vmem>>, vector<1x18x4xf32>
    tpu.vector_store %arg5[%c17, %c0_3, %c0_4], %0 {strides = array<i32>} : memref<18x18x4xf32, #tpu.memory_space<vmem>>, vector<1x18x4xf32>,
    %c0_5 = arith.constant 0 : index
    %c0_6 = arith.constant 0 : index
    %c0_7 = arith.constant 0 : index
    %4 = vector.load %arg5[%c0_5, %c0_6, %c0_7] : memref<18x18x4xf32, #tpu.memory_space<vmem>>, vector<18x1x4xf32>
    tpu.vector_store %arg5[%c0_5, %c0_6, %c0_7], %1 {strides = array<i32>} : memref<18x18x4xf32, #tpu.memory_space<vmem>>, vector<18x1x4xf32>,
    %c0_8 = arith.constant 0 : index
    %c17_9 = arith.constant 17 : index
    %c0_10 = arith.constant 0 : index
    %5 = vector.load %arg5[%c0_8, %c17_9, %c0_10] : memref<18x18x4xf32, #tpu.memory_space<vmem>>, vector<18x1x4xf32>
    tpu.vector_store %arg5[%c0_8, %c17_9, %c0_10], %1 {strides = array<i32>} : memref<18x18x4xf32, #tpu.memory_space<vmem>>, vector<18x1x4xf32>,
    %c0_11 = arith.constant 0 : index
    %c0_12 = arith.constant 0 : index
    %c0_13 = arith.constant 0 : index
    %c0_14 = arith.constant 0 : index
    %6 = vector.load %arg1[%c0_11, %c0_12, %c0_13, %c0_14] : memref<1x16x16x4xf32, #tpu.memory_space<vmem>>, vector<1x16x16x4xf32>
    %7 = vector.shape_cast %6 : vector<1x16x16x4xf32> to vector<16x16x4xf32>
    %c1 = arith.constant 1 : index
    %c1_15 = arith.constant 1 : index
    %c0_16 = arith.constant 0 : index
    %8 = vector.load %arg5[%c1, %c1_15, %c0_16] : memref<18x18x4xf32, #tpu.memory_space<vmem>>, vector<16x16x4xf32>
    tpu.vector_store %arg5[%c1, %c1_15, %c0_16], %7 {strides = array<i32>} : memref<18x18x4xf32, #tpu.memory_space<vmem>>, vector<16x16x4xf32>,
    %c0_17 = arith.constant 0 : index
    %c0_18 = arith.constant 0 : index
    %c0_19 = arith.constant 0 : index
    %9 = vector.load %arg5[%c0_17, %c0_18, %c0_19] : memref<18x18x4xf32, #tpu.memory_space<vmem>>, vector<18x18x4xf32>
    %10 = vector.extract_strided_slice %9 {offsets = [0, 0, 0], sizes = [16, 16, 4], strides = [1, 1, 1]} : vector<18x18x4xf32> to vector<16x16x4xf32>
    %11 = vector.shape_cast %10 : vector<16x16x4xf32> to vector<256x4xf32>
    %12 = vector.extract_strided_slice %9 {offsets = [0, 1, 0], sizes = [16, 16, 4], strides = [1, 1, 1]} : vector<18x18x4xf32> to vector<16x16x4xf32>
    %13 = vector.shape_cast %12 : vector<16x16x4xf32> to vector<256x4xf32>
    %14 = vector.extract_strided_slice %9 {offsets = [0, 2, 0], sizes = [16, 16, 4], strides = [1, 1, 1]} : vector<18x18x4xf32> to vector<16x16x4xf32>
    %15 = vector.shape_cast %14 : vector<16x16x4xf32> to vector<256x4xf32>
    %16 = vector.extract_strided_slice %9 {offsets = [1, 0, 0], sizes = [16, 16, 4], strides = [1, 1, 1]} : vector<18x18x4xf32> to vector<16x16x4xf32>
    %17 = vector.shape_cast %16 : vector<16x16x4xf32> to vector<256x4xf32>
    %18 = vector.extract_strided_slice %9 {offsets = [1, 1, 0], sizes = [16, 16, 4], strides = [1, 1, 1]} : vector<18x18x4xf32> to vector<16x16x4xf32>
    %19 = vector.shape_cast %18 : vector<16x16x4xf32> to vector<256x4xf32>
    %20 = vector.extract_strided_slice %9 {offsets = [1, 2, 0], sizes = [16, 16, 4], strides = [1, 1, 1]} : vector<18x18x4xf32> to vector<16x16x4xf32>
    %21 = vector.shape_cast %20 : vector<16x16x4xf32> to vector<256x4xf32>
    %22 = vector.extract_strided_slice %9 {offsets = [2, 0, 0], sizes = [16, 16, 4], strides = [1, 1, 1]} : vector<18x18x4xf32> to vector<16x16x4xf32>
    %23 = vector.shape_cast %22 : vector<16x16x4xf32> to vector<256x4xf32>
    %24 = vector.extract_strided_slice %9 {offsets = [2, 1, 0], sizes = [16, 16, 4], strides = [1, 1, 1]} : vector<18x18x4xf32> to vector<16x16x4xf32>
    %25 = vector.shape_cast %24 : vector<16x16x4xf32> to vector<256x4xf32>
    %26 = vector.extract_strided_slice %9 {offsets = [2, 2, 0], sizes = [16, 16, 4], strides = [1, 1, 1]} : vector<18x18x4xf32> to vector<16x16x4xf32>
    %27 = vector.shape_cast %26 : vector<16x16x4xf32> to vector<256x4xf32>
    %28 = tpu.concatenate %11, %13, %15, %17, %19, %21, %23, %25, %27 in 1 : vector<256x4xf32>, vector<256x4xf32>, vector<256x4xf32>, vector<256x4xf32>, vector<256x4xf32>, vector<256x4xf32>, vector<256x4xf32>, vector<256x4xf32>, vector<256x4xf32> -> vector<256x36xf32>
    %c0_20 = arith.constant 0 : index
    %c0_21 = arith.constant 0 : index
    %29 = vector.load %arg2[%c0_20, %c0_21] : memref<32x36xf32, #tpu.memory_space<vmem>>, vector<32x36xf32>
    %cst_22 = arith.constant dense<0.000000e+00> : vector<32x256xf32>
    %30 = tpu.matmul %29, %28, %cst_22 {dimension_numbers = #tpu.dot_dimension_numbers<[1], [1], [0], [0], [0, 0, 1, 0], [], []>} : vector<32x36xf32>, vector<256x36xf32>, vector<32x256xf32> -> vector<32x256xf32>
    %c0_23 = arith.constant 0 : index
    %c0_24 = arith.constant 0 : index
    %c0_25 = arith.constant 0 : index
    %31 = vector.load %arg3[%c0_23, %c0_24, %c0_25] : memref<1x32x256xf32, #tpu.memory_space<vmem>>, vector<1x32x256xf32>
    %32 = vector.shape_cast %31 : vector<1x32x256xf32> to vector<32x256xf32>
    %33 = vector.shape_cast %30 : vector<32x256xf32> to vector<1x32x256xf32>
    tpu.vector_store %arg3[%c0_23, %c0_24, %c0_25], %33 {strides = array<i32>} : memref<1x32x256xf32, #tpu.memory_space<vmem>>, vector<1x32x256xf32>,
    %cst_26 = arith.constant dense<0.000000e+00> : vector<32xf32>
    %34 = vector.multi_reduction <add>, %30, %cst_26 [1] : vector<32x256xf32> to vector<32xf32>
    %35 = vector.shape_cast %34 : vector<32xf32> to vector<32x1xf32>
    %36 = arith.mulf %30, %30 : vector<32x256xf32>
    %cst_27 = arith.constant dense<0.000000e+00> : vector<32xf32>
    %37 = vector.multi_reduction <add>, %36, %cst_27 [1] : vector<32x256xf32> to vector<32xf32>
    %38 = vector.shape_cast %37 : vector<32xf32> to vector<32x1xf32>
    %39 = tpu.concatenate %35, %38 in 1 : vector<32x1xf32>, vector<32x1xf32> -> vector<32x2xf32>
    %c0_28 = arith.constant 0 : index
    %c0_29 = arith.constant 0 : index
    %c0_30 = arith.constant 0 : index
    %40 = vector.load %arg4[%c0_28, %c0_29, %c0_30] : memref<1x32x2xf32, #tpu.memory_space<vmem>>, vector<1x32x2xf32>
    %41 = vector.shape_cast %40 : vector<1x32x2xf32> to vector<32x2xf32>
    %42 = vector.shape_cast %39 : vector<32x2xf32> to vector<1x32x2xf32>
    tpu.vector_store %arg4[%c0_28, %c0_29, %c0_30], %42 {strides = array<i32>} : memref<1x32x2xf32, #tpu.memory_space<vmem>>, vector<1x32x2xf32>,
    return
  }
  func.func @transform_0(%arg0: i32) -> (i32, i32, i32, i32) {
    %c0_i32 = arith.constant 0 : i32
    %c0_i32_0 = arith.constant 0 : i32
    %c0_i32_1 = arith.constant 0 : i32
    %c0_i32_2 = arith.constant 0 : i32
    return %arg0, %c0_i32, %c0_i32_0, %c0_i32_1 : i32, i32, i32, i32
  }
  func.func @transform_1(%arg0: i32) -> (i32, i32) {
    %c0_i32 = arith.constant 0 : i32
    %c0_i32_0 = arith.constant 0 : i32
    %c0_i32_1 = arith.constant 0 : i32
    return %c0_i32, %c0_i32_0 : i32, i32
  }
  func.func @transform_2(%arg0: i32) -> (i32, i32, i32) {
    %c0_i32 = arith.constant 0 : i32
    %c0_i32_0 = arith.constant 0 : i32
    %c0_i32_1 = arith.constant 0 : i32
    return %arg0, %c0_i32, %c0_i32_0 : i32, i32, i32
  }
  func.func @transform_3(%arg0: i32) -> (i32, i32, i32) {
    %c0_i32 = arith.constant 0 : i32
    %c0_i32_0 = arith.constant 0 : i32
    %c0_i32_1 = arith.constant 0 : i32
    return %arg0, %c0_i32, %c0_i32_0 : i32, i32, i32
  }
}

</mosaic_0001>

<bundles_post_ra>
// kernel: tpu_custom_call.1
= control target key start
LH: loop header
LB: loop body
LE: loop exit
PB: predicated region body
PF: predicated region fallthrough
CT: control target
= control target key end

     0   :  { %9 = vsyncpa [#allocation4], 0  ;;  %s4339_s0 = inlined_call_operand.vmem [shape: f32[2,16,16,4], index: 0, kind: input, shape index: {}]   ;;  %s4340_s1 = inlined_call_operand.vmem [shape: f32[32,36], index: 1, kind: input, shape index: {}]   ;;  %s4341_s2 = inlined_call_operand.hbm [shape: f32[2,32,256], index: 2, kind: output, shape index: {0}]   ;;  %s4342_s3 = inlined_call_operand.vmem [shape: f32[2,32,2], index: 3, kind: output, shape index: {1}]  }
   0x1   :  { %11 = vsyncpa [#allocation4 + $0x1], 0  ;;  %s2950_s12 = smov 0   ;;  %s2952_s13 = smov 0  }
   0x2   :  { %s2954_s14 = smov 0   ;;  %s2956_s15 = smov 0  }
   0x3 LB: > { %s2971_s16 = sadd.s32 4294967295, %s2917_s15   ;;  %s1975_s17 = sadd.s32 4294967294, %s2917_s15   ;;  %s2917_s15 = sphi %s2956_s15, %s4409_s15   ;;  %s2913_s14 = sphi %s2954_s14, %s4408_s14   ;;  %s2909_s13 = sphi %s2952_s13, %s4407_s13   ;;  %s2905_s12 = sphi %s2950_s12, %s4406_s12  }
   0x4   : > { %s2975_s18 = sadd.s32 1, %s2917_s15   ;;  %s71_s19 = sadd.s32 1, %s2913_s14 }
   0x5   : > { %s68_s20 = ssub.s32 %s2917_s15, %s2975_s18  ;;  %p81_p0 = scmp.ne.s32.totalorder %s2913_s14, %s2909_s13 }
   0x6   : > { %p69_p1 = scmp.eq.s32.totalorder %s68_s20, 0  ;;  %p82_p2 = scmp.eq.s32.totalorder %s2971_s16, 1 }
   0x7   : > { %p87_p3 = scmp.ne.s32.totalorder %s2909_s13, %s2905_s12  ;;  %p88_p4 = scmp.eq.s32.totalorder %s1975_s17, 1 }
   0x8   : > { %s2986_s21 = scalar_select %p69_p1, %s2913_s14, %s71_s19  }
   0x9   : > { %p2988_p5 = por %p82_p2, %p81_p0  ;;  %p2992_p6 = por %p88_p4, %p87_p3 }
   0xa   : > { %p1978_p7 = scmp.ge.s32.totalorder %s2917_s15, 1  ;;  %p143_p8 = scmp.lt.s32.totalorder %s2917_s15, 3 }
   0xc   : > { %p144_p9 = pnand %p1978_p7, %p143_p8 }
   0xe   : > { %147 = sbr.rel (%p144_p9) target bundleno = 811 (0x32b), region = 28 }
  0x15   : > { %vm182_vm0 = vcmask 31744   ;;  %vm185_vm1 = vcmask 25600   ;;  %vm191_vm2 = vcmask 24576   ;;  %p172_p10 = scmp.lt.s32.totalorder %s2971_s16, 1  ;;  %v2919_v0 = vmov 0.0   ;;  %s2920_s29 = smov 4  }
  0x16   : > { %183 = vst.msk [vmem:[#allocation2] sm:$0xff] %vm182_vm0, %v2919_v0  ;;  %184 = vst.msk [vmem:[#allocation2 + $0x8] sm:$0xff] %vm182_vm0, %v2919_v0  ;;  %vm395_vm3 = vcmask 1046528   ;;  %vm476_vm4 = vcmask 1045504   ;;  %s2921_s30 = smov 8   ;;  %s2922_s4 = smov 12  }
  0x17   : > { %186 = vst.msk [vmem:[#allocation2 + $0x10] sm:$0x3] %vm185_vm1, %v2919_v0  ;;  %190 = vst.msk [vmem:[#allocation2 + $0x1a8] sm:$0x3] %vm185_vm1, %v2919_v0  ;;  %s3041_s24 = scalar_select %p172_p10, %s2971_s16, 1  ;;  %vm1383_vm5 = vcmask 64512  }
  0x18   : > { %188 = vst.msk [vmem:[#allocation2 + $0x198] sm:$0xff] %vm182_vm0, %v2919_v0  ;;  %189 = vst.msk [vmem:[#allocation2 + $0x1a0] sm:$0xff] %vm182_vm0, %v2919_v0  ;;  %s2923_s5 = smov 16   ;;  %s2924_s6 = smov 20   ;;  %vm1416_vm6 = vcmask 97280   ;;  %vm1449_vm7 = vcmask 130048  }
  0x19   : > { %193 = vst.msk [vmem:[#allocation2 + $0x18] sm:$0x1] %vm191_vm2, %v2919_v0  ;;  %194 = vst.msk [vmem:[#allocation2 + $0x30] sm:$0x1] %vm191_vm2, %v2919_v0  ;;  %s2025_s25 = sshll.u32 %s3041_s24, 8  ;;  %s2925_s7 = smov 24  }
  0x1a   : > { %195 = vst.msk [vmem:[#allocation2 + $0x48] sm:$0x1] %vm191_vm2, %v2919_v0  ;;  %196 = vst.msk [vmem:[#allocation2 + $0x60] sm:$0x1] %vm191_vm2, %v2919_v0  ;;  %s3048_s28 = scalar_lea.vmem %s4339_s0, %s2025_s25  ;;  %s2926_s8 = smov 28   ;;  %vm1482_vm8 = vcmask 162816  }
  0x1b   : > { %197 = vst.msk [vmem:[#allocation2 + $0x78] sm:$0x1] %vm191_vm2, %v2919_v0  ;;  %198 = vst.msk [vmem:[#allocation2 + $0x90] sm:$0x1] %vm191_vm2, %v2919_v0  ;;  %v230_v1 = vld [vmem:[%s3048_s28 + $0x10] sm:$0xff]  ;;  %v231_v2 = vld [vmem:[%s3048_s28 + $0x18] sm:$0xff] }
  0x1c   : > { %199 = vst.msk [vmem:[#allocation2 + $0xa8] sm:$0x1] %vm191_vm2, %v2919_v0  ;;  %200 = vst.msk [vmem:[#allocation2 + $0xc0] sm:$0x1] %vm191_vm2, %v2919_v0  ;;  %v228_v3 = vld [vmem:[%s3048_s28] sm:$0xff]  ;;  %v229_v4 = vld [vmem:[%s3048_s28 + $0x8] sm:$0xff] }
  0x1d   : > { %201 = vst.msk [vmem:[#allocation2 + $0xd8] sm:$0x1] %vm191_vm2, %v2919_v0  ;;  %202 = vst.msk [vmem:[#allocation2 + $0xf0] sm:$0x1] %vm191_vm2, %v2919_v0  ;;  %v232_v5 = vld [vmem:[%s3048_s28 + $0x20] sm:$0xff]  ;;  %v233_v6 = vld [vmem:[%s3048_s28 + $0x28] sm:$0xff] }
  0x1e   : > { %203 = vst.msk [vmem:[#allocation2 + $0x108] sm:$0x1] %vm191_vm2, %v2919_v0  ;;  %204 = vst.msk [vmem:[#allocation2 + $0x120] sm:$0x1] %vm191_vm2, %v2919_v0  ;;  %v3059_v7 = vld [vmem:[#allocation2 + $0x8] sm:$0xff]  ;;  %v234_v8 = vld [vmem:[%s3048_s28 + $0x30] sm:$0xff] }
  0x1f   : > { %205 = vst.msk [vmem:[#allocation2 + $0x138] sm:$0x1] %vm191_vm2, %v2919_v0  ;;  %206 = vst.msk [vmem:[#allocation2 + $0x150] sm:$0x1] %vm191_vm2, %v2919_v0  ;;  %v235_v9 = vld [vmem:[%s3048_s28 + $0x38] sm:$0xff]  ;;  %v397_v12 = vrot.slane %v3059_v7, 1 }
  0x20   : > { %207 = vst.msk [vmem:[#allocation2 + $0x168] sm:$0x1] %vm191_vm2, %v2919_v0  ;;  %208 = vst.msk [vmem:[#allocation2 + $0x180] sm:$0x1] %vm191_vm2, %v2919_v0  ;;  %v236_v13 = vld [vmem:[%s3048_s28 + $0x40] sm:$0xff]  ;;  %v237_v16 = vld [vmem:[%s3048_s28 + $0x48] sm:$0xff] }
  0x21   : > { %211 = vst.msk [vmem:[#allocation2 + $0x29] sm:$0x1] %vm191_vm2, %v2919_v0  ;;  %212 = vst.msk [vmem:[#allocation2 + $0x41] sm:$0x1] %vm191_vm2, %v2919_v0  ;;  %v238_v17 = vld [vmem:[%s3048_s28 + $0x50] sm:$0xff]  ;;  %v239_v18 = vld [vmem:[%s3048_s28 + $0x58] sm:$0xff] }
  0x22   : > { %213 = vst.msk [vmem:[#allocation2 + $0x59] sm:$0x1] %vm191_vm2, %v2919_v0  ;;  %214 = vst.msk [vmem:[#allocation2 + $0x71] sm:$0x1] %vm191_vm2, %v2919_v0  ;;  %v240_v19 = vld [vmem:[%s3048_s28 + $0x60] sm:$0xff]  ;;  %v241_v20 = vld [vmem:[%s3048_s28 + $0x68] sm:$0xff] }
  0x23   : > { %215 = vst.msk [vmem:[#allocation2 + $0x89] sm:$0x1] %vm191_vm2, %v2919_v0  ;;  %216 = vst.msk [vmem:[#allocation2 + $0xa1] sm:$0x1] %vm191_vm2, %v2919_v0  ;;  %v242_v21 = vld [vmem:[%s3048_s28 + $0x70] sm:$0xff]  ;;  %v243_v24 = vld [vmem:[%s3048_s28 + $0x78] sm:$0xff] }
  0x24   : > { %217 = vst.msk [vmem:[#allocation2 + $0xb9] sm:$0x1] %vm191_vm2, %v2919_v0  ;;  %218 = vst.msk [vmem:[#allocation2 + $0xd1] sm:$0x1] %vm191_vm2, %v2919_v0  ;;  %v244_v25 = vld [vmem:[%s3048_s28 + $0x80] sm:$0xff]  ;;  %v245_v26 = vld [vmem:[%s3048_s28 + $0x88] sm:$0xff] }
  0x25   : > { %219 = vst.msk [vmem:[#allocation2 + $0xe9] sm:$0x1] %vm191_vm2, %v2919_v0  ;;  %220 = vst.msk [vmem:[#allocation2 + $0x101] sm:$0x1] %vm191_vm2, %v2919_v0  ;;  %v246_v28 = vld [vmem:[%s3048_s28 + $0x90] sm:$0xff]  ;;  %v247_v29 = vld [vmem:[%s3048_s28 + $0x98] sm:$0xff] }
  0x26   : > { %221 = vst.msk [vmem:[#allocation2 + $0x119] sm:$0x1] %vm191_vm2, %v2919_v0  ;;  %222 = vst.msk [vmem:[#allocation2 + $0x131] sm:$0x1] %vm191_vm2, %v2919_v0  ;;  %v248_v30 = vld [vmem:[%s3048_s28 + $0xa0] sm:$0xff]  ;;  %s2927_s9 = smov 32  }
  0x27   : > { %223 = vst.msk [vmem:[#allocation2 + $0x149] sm:$0x1] %vm191_vm2, %v2919_v0  ;;  %224 = vst.msk [vmem:[#allocation2 + $0x161] sm:$0x1] %vm191_vm2, %v2919_v0  ;;  %vm1515_vm9 = vcmask 195584   ;;  %vm1548_vm10 = vcmask 228352  }
  0x28   : > { %225 = vst.msk [vmem:[#allocation2 + $0x179] sm:$0x1] %vm191_vm2, %v2919_v0  ;;  %226 = vst.msk [vmem:[#allocation2 + $0x191] sm:$0x1] %vm191_vm2, %v2919_v0  ;;  %vm1618_vm11 = vcmask 293888   ;;  %vm1581_vm12 = vcmask 261120  }
  0x29   : > { %192 = vst.msk [vmem:[#allocation2] sm:$0x1] %vm191_vm2, %v2919_v0  ;;  %210 = vst.msk [vmem:[#allocation2 + $0x11] sm:$0x1] %vm191_vm2, %v2919_v0 }
  0x2a   : > { %227 = vst.msk [vmem:[#allocation2 + $0x1a9] sm:$0x1] %vm191_vm2, %v2919_v0  ;;  %209 = vst.msk [vmem:[#allocation2 + $0x198] sm:$0x1] %vm191_vm2, %v2919_v0 }
  0x2b   : > { %263 = vst.msk [vmem:[#allocation2 + $0x31] sm:$0xff] %vm182_vm0, %v230_v1  ;;  %264 = vst.msk [vmem:[#allocation2 + $0x39] sm:$0xff] %vm182_vm0, %v231_v2 }
  0x2c   : > { %261 = vst.msk [vmem:[#allocation2 + $0x19] sm:$0xff] %vm182_vm0, %v228_v3  ;;  %262 = vst.msk [vmem:[#allocation2 + $0x21] sm:$0xff] %vm182_vm0, %v229_v4 }
  0x2d   : > { %265 = vst.msk [vmem:[#allocation2 + $0x49] sm:$0xff] %vm182_vm0, %v232_v5  ;;  %266 = vst.msk [vmem:[#allocation2 + $0x51] sm:$0xff] %vm182_vm0, %v233_v6 }
  0x2e   : > { %267 = vst.msk [vmem:[#allocation2 + $0x61] sm:$0xff] %vm182_vm0, %v234_v8  ;;  %268 = vst.msk [vmem:[#allocation2 + $0x69] sm:$0xff] %vm182_vm0, %v235_v9 }
  0x2f   : > { %269 = vst.msk [vmem:[#allocation2 + $0x79] sm:$0xff] %vm182_vm0, %v236_v13  ;;  %270 = vst.msk [vmem:[#allocation2 + $0x81] sm:$0xff] %vm182_vm0, %v237_v16 }
  0x30   : > { %v3066_v10 = vld [vmem:[#allocation2] sm:$0xff]  ;;  %v3068_v11 = vld [vmem:[#allocation2 + $0x10] sm:$0x3]  ;;  %271 = vst.msk [vmem:[#allocation2 + $0x91] sm:$0xff] %vm182_vm0, %v238_v17  ;;  %272 = vst.msk [vmem:[#allocation2 + $0x99] sm:$0xff] %vm182_vm0, %v239_v18 }
  0x31   : > { %v396_v14 = vrot.slane %v3066_v10, 1  ;;  %v399_v15 = vrot.slane %v3068_v11, 1  ;;  %273 = vst.msk [vmem:[#allocation2 + $0xa9] sm:$0xff] %vm182_vm0, %v240_v19  ;;  %274 = vst.msk [vmem:[#allocation2 + $0xb1] sm:$0xff] %vm182_vm0, %v241_v20 }
  0x32   : > { %275 = vst.msk [vmem:[#allocation2 + $0xc1] sm:$0xff] %vm182_vm0, %v242_v21  ;;  %276 = vst.msk [vmem:[#allocation2 + $0xc9] sm:$0xff] %vm182_vm0, %v243_v24  ;;  %v3100_v31 = vld [vmem:[#allocation2 + $0x30] sm:$0xff]  ;;  %v3102_v32 = vld [vmem:[#allocation2 + $0x38] sm:$0xff] }
  0x33   : > { %v398_v22 = vsel %vm395_vm3, %v396_v14, %v397_v12  ;;  %v400_v23 = vsel %vm395_vm3, %v397_v12, %v399_v15  ;;  %277 = vst.msk [vmem:[#allocation2 + $0xd9] sm:$0xff] %vm182_vm0, %v244_v25  ;;  %278 = vst.msk [vmem:[#allocation2 + $0xe1] sm:$0xff] %vm182_vm0, %v245_v26  ;;  %v3104_v33 = vld [vmem:[#allocation2 + $0x40] sm:$0x3]  ;;  %v406_v34 = vrot.slane %v3100_v31, 1  ;;  %v407_v35 = vrot.slane %v3102_v32, 1 }
  0x34   : > { %v2181_v27 = vpack.i.bf16 %v400_v23, %v398_v22  ;;  %4372 = vst [vmem:[#allocation6_spill] sm:$0xff] %v3100_v31  ;;  %279 = vst.msk [vmem:[#allocation2 + $0xf1] sm:$0xff] %vm182_vm0, %v246_v28  ;;  %v409_v36 = vrot.slane %v3104_v33, 1  ;;  %v3113_v37 = vld [vmem:[#allocation2 + $0x18] sm:$0xff]  ;;  %v3115_v38 = vld [vmem:[#allocation2 + $0x20] sm:$0xff] }
  0x35   : > { %280 = vst.msk [vmem:[#allocation2 + $0xf9] sm:$0xff] %vm182_vm0, %v247_v29  ;;  %281 = vst.msk [vmem:[#allocation2 + $0x109] sm:$0xff] %vm182_vm0, %v248_v30  ;;  %v3117_v39 = vld [vmem:[#allocation2 + $0x28] sm:$0x3]  ;;  %v401_v40 = vrot.slane %v3113_v37, 1  ;;  %v402_v41 = vrot.slane %v3115_v38, 1  ;;  %v408_v44 = vsel %vm395_vm3, %v406_v34, %v407_v35 }
  0x36   : > { %2182 = vrot.lane.b32.xlu0 %v2181_v27, %s2920_s29  ;;  %4373 = vst [vmem:[#allocation7_spill] sm:$0xff] %v3113_v37  ;;  %4374 = vst [vmem:[#allocation8_spill] sm:$0xff] %v3115_v38  ;;  %v3121_v42 = vld [vmem:[#allocation2 + $0x48] sm:$0xff]  ;;  %v3123_v43 = vld [vmem:[#allocation2 + $0x50] sm:$0xff]  ;;  %v410_v45 = vsel %vm395_vm3, %v407_v35, %v409_v36  ;;  %v404_v46 = vrot.slane %v3117_v39, 1 }
  0x37   : > { %v3128_v47 = vld [vmem:[#allocation2 + $0x58] sm:$0x3]  ;;  %v411_v48 = vrot.slane %v3121_v42, 1  ;;  %v3131_v49 = vld [vmem:[#allocation2 + $0x60] sm:$0xff]  ;;  %v3133_v50 = vld [vmem:[#allocation2 + $0x68] sm:$0xff]  ;;  %v3135_v51 = vpack.i.bf16 %v410_v45, %v408_v44  ;;  %v403_v52 = vsel %vm395_vm3, %v401_v40, %v402_v41  ;;  %v412_v53 = vrot.slane %v3123_v43, 1 }
  0x38   : > { %v414_v54 = vrot.slane %v3128_v47, 1  ;;  %v3140_v55 = vld [vmem:[#allocation2 + $0x70] sm:$0x3]  ;;  %v3142_v56 = vld [vmem:[#allocation2 + $0x78] sm:$0xff]  ;;  %v3144_v57 = vld [vmem:[#allocation2 + $0x80] sm:$0xff]  ;;  %v405_v58 = vsel %vm395_vm3, %v402_v41, %v404_v46  ;;  %v416_v59 = vrot.slane %v3131_v49, 1 }
  0x39   : > { %4375 = vst [vmem:[#allocation9_spill] sm:$0xff] %v3135_v51  ;;  %v417_v60 = vrot.slane %v3133_v50, 1  ;;  %v419_v61 = vrot.slane %v3140_v55, 1  ;;  %v3150_v62 = vld [vmem:[#allocation2 + $0x88] sm:$0x3]  ;;  %v3152_v63 = vld [vmem:[#allocation2 + $0x90] sm:$0xff]  ;;  %2192 = vrot.lane.b32.xlu1 %v3135_v51, %s2920_s29  ;;  %v3156_v0 = vpack.i.bf16 %v405_v58, %v403_v52  ;;  %v413_v1 = vsel %vm395_vm3, %v411_v48, %v412_v53  ;;  %vm3733_vm13 = vmpackc.low %vm1618_vm11, %vm1618_vm11 }
  0x3a   : > { %v415_v2 = vsel %vm395_vm3, %v412_v53, %v414_v54  ;;  %v421_v3 = vrot.slane %v3142_v56, 1  ;;  %v3161_v4 = vld [vmem:[#allocation2 + $0x98] sm:$0xff]  ;;  %v3163_v5 = vld [vmem:[#allocation2 + $0xa0] sm:$0x3]  ;;  %v3165_v6 = vld [vmem:[#allocation2 + $0xa8] sm:$0xff]  ;;  %v422_v13 = vrot.slane %v3144_v57, 1 }
  0x3b   : > { %4376 = vst [vmem:[#allocation10_spill] sm:$0xff] %v3156_v0  ;;  %v3167_v8 = vpack.i.bf16 %v415_v2, %v413_v1  ;;  %v418_v9 = vsel %vm395_vm3, %v416_v59, %v417_v60  ;;  %v420_v12 = vsel %vm395_vm3, %v417_v60, %v419_v61  ;;  %v3172_v14 = vld [vmem:[#allocation2 + $0xb0] sm:$0xff]  ;;  %v3174_v15 = vld [vmem:[#allocation2 + $0xb8] sm:$0x3]  ;;  %v3176_v16 = vld [vmem:[#allocation2 + $0xc0] sm:$0xff]  ;;  %2187 = vrot.lane.b32.xlu0 %v3156_v0, %s2920_s29  ;;  %v424_v18 = vrot.slane %v3150_v62, 1 }
  0x3c   : > { %v3180_v17 = vpack.i.bf16 %v420_v12, %v418_v9  ;;  %v426_v19 = vrot.slane %v3152_v63, 1  ;;  %v427_v20 = vrot.slane %v3161_v4, 1  ;;  %v3185_v21 = vld [vmem:[#allocation2 + $0xc8] sm:$0xff]  ;;  %v3187_v22 = vld [vmem:[#allocation2 + $0xd0] sm:$0x3]  ;;  %v423_v23 = vsel %vm395_vm3, %v421_v3, %v422_v13  ;;  %v3193_v27 = vld [vmem:[#allocation2 + $0xd8] sm:$0xff] }
  0x3d   : > { %4377 = vst [vmem:[#allocation11_spill] sm:$0xff] %v3167_v8  ;;  %v429_v24 = vrot.slane %v3163_v5, 1  ;;  %v431_v25 = vrot.slane %v3165_v6, 1  ;;  %v432_v26 = vrot.slane %v3172_v14, 1  ;;  %v3195_v28 = vld [vmem:[#allocation2 + $0xe0] sm:$0xff]  ;;  %2197 = vrot.lane.b32.xlu1 %v3167_v8, %s2920_s29  ;;  %v425_v29 = vsel %vm395_vm3, %v422_v13, %v424_v18  ;;  %v3205_v40 = vld [vmem:[#allocation2 + $0xf0] sm:$0xff] }
  0x3e   : > { %4378 = vst [vmem:[#allocation12_spill] sm:$0xff] %v3180_v17  ;;  %v428_v30 = vsel %vm395_vm3, %v426_v19, %v427_v20  ;;  %v434_v34 = vrot.slane %v3174_v15, 1  ;;  %v436_v35 = vrot.slane %v3176_v16, 1  ;;  %v3203_v36 = vld [vmem:[#allocation2 + $0xe8] sm:$0x3]  ;;  %v3208_v44 = vpack.i.bf16 %v425_v29, %v423_v23  ;;  %v3213_v52 = vld [vmem:[#allocation2 + $0xf8] sm:$0xff] }
  0x3f   : > { %v249_v41 = vld [vmem:[%s3048_s28 + $0xa8] sm:$0xff]  ;;  %v430_v45 = vsel %vm395_vm3, %v427_v20, %v429_v24  ;;  %v433_v46 = vsel %vm395_vm3, %v431_v25, %v432_v26  ;;  %v437_v48 = vrot.slane %v3185_v21, 1  ;;  %v3215_v53 = vld [vmem:[#allocation2 + $0x100] sm:$0x3]  ;;  %v250_v54 = vld [vmem:[%s3048_s28 + $0xb0] sm:$0xff]  ;;  %2202 = vrot.lane.b32.xlu0 %v3180_v17, %s2920_s29  ;;  %v439_v60 = vrot.slane %v3187_v22, 1 }
  0x40   : > { %4379 = vst [vmem:[#allocation13_spill] sm:$0xff] %v3208_v44  ;;  %282 = vst.msk [vmem:[#allocation2 + $0x111] sm:$0xff] %vm182_vm0, %v249_v41  ;;  %v3221_v58 = vpack.i.bf16 %v430_v45, %v428_v30  ;;  %v435_v59 = vsel %vm395_vm3, %v432_v26, %v434_v34  ;;  %v441_v61 = vrot.slane %v3193_v27, 1  ;;  %v251_v1 = vld [vmem:[%s3048_s28 + $0xb8] sm:$0xff]  ;;  %v252_v2 = vld [vmem:[%s3048_s28 + $0xc0] sm:$0xff]  ;;  %v442_v13 = vrot.slane %v3195_v28, 1 }
  0x41   : > { %283 = vst.msk [vmem:[#allocation2 + $0x121] sm:$0xff] %vm182_vm0, %v250_v54  ;;  %v253_v3 = vld [vmem:[%s3048_s28 + $0xc8] sm:$0xff]  ;;  %v3230_v9 = vpack.i.bf16 %v435_v59, %v433_v46  ;;  %v438_v12 = vsel %vm395_vm3, %v436_v35, %v437_v48  ;;  %v444_v18 = vrot.slane %v3203_v36, 1  ;;  %284 = vst.msk [vmem:[#allocation2 + $0x129] sm:$0xff] %vm182_vm0, %v251_v1  ;;  %v254_v19 = vld [vmem:[%s3048_s28 + $0xd0] sm:$0xff]  ;;  %2207 = vrot.lane.b32.xlu1 %v3208_v44, %s2920_s29  ;;  %v446_v25 = vrot.slane %v3205_v40, 1 }
  0x42   : > { %4380 = vst [vmem:[#allocation14_spill] sm:$0xff] %v3221_v58  ;;  %285 = vst.msk [vmem:[#allocation2 + $0x139] sm:$0xff] %vm182_vm0, %v252_v2  ;;  %v255_v20 = vld [vmem:[%s3048_s28 + $0xd8] sm:$0xff]  ;;  %v256_v23 = vld [vmem:[%s3048_s28 + $0xe0] sm:$0xff]  ;;  %v440_v24 = vsel %vm395_vm3, %v437_v48, %v439_v60  ;;  %v447_v26 = vrot.slane %v3213_v52, 1  ;;  %v449_v29 = vrot.slane %v3215_v53, 1  ;;  %v443_v35 = vsel %vm395_vm3, %v441_v61, %v442_v13 }
  0x43   : > { %4381 = vst [vmem:[#allocation15_spill] sm:$0xff] %v3230_v9  ;;  %286 = vst.msk [vmem:[#allocation2 + $0x141] sm:$0xff] %vm182_vm0, %v253_v3  ;;  %v3247_v30 = vld [vmem:[#allocation2 + $0x108] sm:$0xff]  ;;  %v445_v41 = vsel %vm395_vm3, %v442_v13, %v444_v18  ;;  %2212 = vrot.lane.b32.xlu0 %v3221_v58, %s2920_s29  ;;  %v3258_v45 = vpack.i.bf16 %v440_v24, %v438_v12  ;;  %v478_v59 = vrot.slane %v3059_v7, 2  ;;  %v480_v60 = vrot.slane %v3068_v11, 2 }
  0x44   : > { %287 = vst.msk [vmem:[#allocation2 + $0x151] sm:$0xff] %vm182_vm0, %v254_v19  ;;  %288 = vst.msk [vmem:[#allocation2 + $0x159] sm:$0xff] %vm182_vm0, %v255_v20  ;;  %v257_v34 = vld [vmem:[%s3048_s28 + $0xe8] sm:$0xff]  ;;  %v448_v46 = vsel %vm395_vm3, %v446_v25, %v447_v26  ;;  %v450_v48 = vsel %vm395_vm3, %v447_v26, %v449_v29  ;;  %v451_v54 = vrot.slane %v3247_v30, 1  ;;  %v3267_v61 = vpack.i.bf16 %v445_v41, %v443_v35 }
  0x45   : > { %289 = vst.msk [vmem:[#allocation2 + $0x169] sm:$0xff] %vm182_vm0, %v256_v23  ;;  %290 = vst.msk [vmem:[#allocation2 + $0x171] sm:$0xff] %vm182_vm0, %v257_v34  ;;  %2217 = vrot.lane.b32.xlu1 %v3230_v9, %s2920_s29  ;;  %v477_v3 = vrot.slane %v3066_v10, 2  ;;  %v482_v12 = vrot.slane %v3113_v37, 2  ;;  %v483_v11 = vrot.slane %v3115_v38, 2  ;;  %v485_v19 = vrot.slane %v3117_v39, 2 }
  0x46   : > { %4382 = vst [vmem:[#allocation16_spill] sm:$0xff] %v3258_v45  ;;  %4383 = vst [vmem:[#allocation17_spill] sm:$0xff] %v3267_v61  ;;  %v3283_v20 = vpack.i.bf16 %v450_v48, %v448_v46  ;;  %v487_v26 = vrot.slane %v3100_v31, 2  ;;  %v488_v38 = vrot.slane %v3102_v32, 2  ;;  %v490_v37 = vrot.slane %v3104_v33, 2 }
  0x47   : > { %v3269_v1 = vld [vmem:[#allocation2 + $0x110] sm:$0xff]  ;;  %v3271_v2 = vld [vmem:[#allocation2 + $0x118] sm:$0x3]  ;;  %2222 = vrot.lane.b32.xlu0 %v3258_v45, %s2920_s29 }
  0x48   : > { %v452_v13 = vrot.slane %v3269_v1, 1  ;;  %v454_v18 = vrot.slane %v3271_v2, 1  ;;  %v3277_v7 = vld [vmem:[#allocation2 + $0x120] sm:$0xff]  ;;  %v3285_v23 = vld [vmem:[#allocation2 + $0x128] sm:$0xff]  ;;  %v3287_v10 = vld [vmem:[#allocation2 + $0x130] sm:$0x3] }
  0x49   : > { %v456_v24 = vrot.slane %v3277_v7, 1  ;;  %v3290_v25 = vld [vmem:[#allocation2 + $0x138] sm:$0xff]  ;;  %v457_v39 = vrot.slane %v3285_v23, 1  ;;  %v459_v35 = vrot.slane %v3287_v10, 1  ;;  %2227 = vrot.lane.b32.xlu1 %v3267_v61, %s2920_s29 }
  0x4a   : > { %v453_v29 = vsel %vm395_vm3, %v451_v54, %v452_v13  ;;  %v455_v34 = vsel %vm395_vm3, %v452_v13, %v454_v18  ;;  %v3297_v41 = vld [vmem:[#allocation2 + $0x140] sm:$0xff]  ;;  %v3299_v46 = vld [vmem:[#allocation2 + $0x148] sm:$0x3]  ;;  %v461_v9 = vrot.slane %v3290_v25, 1 }
  0x4b   : > { %v3301_v48 = vld [vmem:[#allocation2 + $0x150] sm:$0xff]  ;;  %v3305_v45 = vpack.i.bf16 %v455_v34, %v453_v29  ;;  %v462_v54 = vrot.slane %v3297_v41, 1  ;;  %v464_v13 = vrot.slane %v3299_v46, 1  ;;  %v3310_v18 = vld [vmem:[#allocation2 + $0x158] sm:$0xff]  ;;  %v3312_v58 = vld [vmem:[#allocation2 + $0x160] sm:$0x3]  ;;  %v458_v44 = vsel %vm395_vm3, %v456_v24, %v457_v39  ;;  %2232 = vrot.lane.b32.xlu0 %v3283_v20, %s2920_s29 }
  0x4c   : > { %4384 = vst [vmem:[#allocation18_spill] sm:$0xff] %v3301_v48  ;;  %4385 = vst [vmem:[#allocation19_spill] sm:$0xff] %v3310_v18  ;;  %v460_v17 = vsel %vm395_vm3, %v457_v39, %v459_v35  ;;  %v466_v8 = vrot.slane %v3301_v48, 1  ;;  %v467_v51 = vrot.slane %v3310_v18, 1  ;;  %v3318_v29 = vld [vmem:[#allocation2 + $0x168] sm:$0xff]  ;;  %v3320_v34 = vld [vmem:[#allocation2 + $0x170] sm:$0xff] }
  0x4d   : > { %4386 = vst [vmem:[#allocation20_spill] sm:$0xff] %v3320_v34  ;;  %v3322_v31 = vld [vmem:[#allocation2 + $0x178] sm:$0x3]  ;;  %v3326_v0 = vpack.i.bf16 %v460_v17, %v458_v44  ;;  %v463_v61 = vsel %vm395_vm3, %v461_v9, %v462_v54  ;;  %v465_v24 = vsel %vm395_vm3, %v462_v54, %v464_v13  ;;  %v469_v39 = vrot.slane %v3312_v58, 1  ;;  %2237 = vrot.lane.b32.xlu1 %v3305_v45, %s2920_s29 }
  0x4e   : > { %v468_v35 = vsel %vm395_vm3, %v466_v8, %v467_v51  ;;  %v471_v18 = vrot.slane %v3318_v29, 1  ;;  %v472_v48 = vrot.slane %v3320_v34, 1  ;;  %v3338_v17 = vpack.i.bf16 %v465_v24, %v463_v61 }
  0x4f   : > { %v470_v44 = vsel %vm395_vm3, %v467_v51, %v469_v39  ;;  %v474_v9 = vrot.slane %v3322_v31, 1  ;;  %v481_v8 = vsel %vm476_vm4, %v478_v59, %v480_v60  ;;  %2242 = vrot.lane.b32.xlu0 %v3326_v0, %s2920_s29  ;;  %v479_v34 = vsel %vm476_vm4, %v477_v3, %v478_v59 }
  0x50   : > { %v473_v54 = vsel %vm395_vm3, %v471_v18, %v472_v48  ;;  %v3346_v13 = vpack.i.bf16 %v470_v44, %v468_v35  ;;  %v492_v61 = vrot.slane %v3121_v42, 2  ;;  %v484_v24 = vsel %vm476_vm4, %v482_v12, %v483_v11 }
  0x51   : > { %v475_v33 = vsel %vm395_vm3, %v472_v48, %v474_v9  ;;  %v486_v51 = vsel %vm476_vm4, %v483_v11, %v485_v19  ;;  %v489_v39 = vsel %vm476_vm4, %v487_v26, %v488_v38  ;;  %v493_v18 = vrot.slane %v3123_v43, 2  ;;  %2247 = vrot.lane.b32.xlu1 %v3338_v17, %s2920_s29 }
  0x52   : > { %v3357_v60 = vpack.i.bf16 %v475_v33, %v473_v54  ;;  %v491_v35 = vsel %vm476_vm4, %v488_v38, %v490_v37  ;;  %v495_v48 = vrot.slane %v3128_v47, 2  ;;  %v497_v59 = vrot.slane %v3131_v49, 2 }
  0x53   : > { %v498_v3 = vrot.slane %v3133_v50, 2  ;;  %v500_v12 = vrot.slane %v3140_v55, 2  ;;  %v502_v11 = vrot.slane %v3142_v56, 2  ;;  %v503_v19 = vrot.slane %v3144_v57, 2  ;;  %2252 = vrot.lane.b32.xlu0 %v3346_v13, %s2920_s29 }
  0x54   : > { %v2261_v26 = vpack.i.bf16 %v481_v8, %v479_v34  ;;  %v505_v44 = vrot.slane %v3150_v62, 2  ;;  %v3371_v37 = vpack.i.bf16 %v486_v51, %v484_v24  ;;  %v3373_v38 = vpack.i.bf16 %v491_v35, %v489_v39 }
  0x55   : > { %2257 = vrot.lane.b32.xlu1 %v3357_v60, %s2920_s29  ;;  %v494_v47 = vsel %vm476_vm4, %v492_v61, %v493_v18  ;;  %v496_v55 = vsel %vm476_vm4, %v493_v18, %v495_v48  ;;  %v499_v9 = vsel %vm476_vm4, %v497_v59, %v498_v3  ;;  %v501_v54 = vsel %vm476_vm4, %v498_v3, %v500_v12 }
  0x56   : > { %v504_v33 = vsel %vm476_vm4, %v502_v11, %v503_v19  ;;  %v507_v34 = vrot.slane %v3152_v63, 2  ;;  %v506_v62 = vsel %vm476_vm4, %v503_v19, %v505_v44  ;;  %v508_v8 = vrot.slane %v3161_v4, 2 }
  0x57   : > { %2262 = vrot.lane.b32.xlu0 %v2261_v26, %s2921_s30  ;;  %v510_v24 = vrot.slane %v3163_v5, 2  ;;  %v512_v61 = vrot.slane %v3165_v6, 2  ;;  %v513_v51 = vrot.slane %v3172_v14, 2  ;;  %v515_v39 = vrot.slane %v3174_v15, 2 }
  0x58   : > { %v517_v18 = vrot.slane %v3176_v16, 2  ;;  %v518_v35 = vrot.slane %v3185_v21, 2  ;;  %v3392_v48 = vpack.i.bf16 %v496_v55, %v494_v47  ;;  %v520_v59 = vrot.slane %v3187_v22, 2 }
  0x59   : > { %2267 = vrot.lane.b32.xlu1 %v3371_v37, %s2921_s30  ;;  %v522_v3 = vrot.slane %v3193_v27, 2  ;;  %v523_v5 = vrot.slane %v3195_v28, 2  ;;  %v525_v12 = vrot.slane %v3203_v36, 2  ;;  %v3400_v15 = vpack.i.bf16 %v501_v54, %v499_v9 }
  0x5a   : > { %v3402_v11 = vpack.i.bf16 %v506_v62, %v504_v33  ;;  %v509_v19 = vsel %vm476_vm4, %v507_v34, %v508_v8  ;;  %v511_v26 = vsel %vm476_vm4, %v508_v8, %v510_v24  ;;  %v514_v44 = vsel %vm476_vm4, %v512_v61, %v513_v51 }
  0x5b   : > { %2272 = vrot.lane.b32.xlu0 %v3373_v38, %s2921_s30  ;;  %v516_v22 = vsel %vm476_vm4, %v513_v51, %v515_v39  ;;  %v519_v47 = vsel %vm476_vm4, %v517_v18, %v518_v35  ;;  %v521_v36 = vsel %vm476_vm4, %v518_v35, %v520_v59  ;;  %v524_v55 = vsel %vm476_vm4, %v522_v3, %v523_v5 }
  0x5c   : > { %v527_v9 = vrot.slane %v3205_v40, 2  ;;  %v528_v54 = vrot.slane %v3213_v52, 2  ;;  %v526_v33 = vsel %vm476_vm4, %v523_v5, %v525_v12  ;;  %v530_v34 = vrot.slane %v3215_v53, 2 }
  0x5d   : > { %2277 = vrot.lane.b32.xlu1 %v3392_v48, %s2921_s30  ;;  %v532_v62 = vrot.slane %v3247_v30, 2  ;;  %v533_v8 = vrot.slane %v3269_v1, 2  ;;  %v3421_v24 = vpack.i.bf16 %v511_v26, %v509_v19  ;;  %v535_v61 = vrot.slane %v3271_v2, 2 }
  0x5e   : > { %v3424_v51 = vpack.i.bf16 %v516_v22, %v514_v44  ;;  %v537_v39 = vrot.slane %v3277_v7, 2  ;;  %v538_v18 = vrot.slane %v3285_v23, 2  ;;  %v3430_v53 = vpack.i.bf16 %v521_v36, %v519_v47 }
  0x5f   : > { %2282 = vrot.lane.b32.xlu0 %v3400_v15, %s2921_s30  ;;  %v3432_v35 = vpack.i.bf16 %v526_v33, %v524_v55  ;;  %v540_v59 = vrot.slane %v3287_v10, 2  ;;  %v529_v3 = vsel %vm476_vm4, %v527_v9, %v528_v54  ;;  %v531_v5 = vsel %vm476_vm4, %v528_v54, %v530_v34  ;;  %v4387_v34 = vld [vmem:[#allocation7_spill] sm:$0xff] }
  0x60   : > { %v534_v2 = vsel %vm476_vm4, %v532_v62, %v533_v8  ;;  %v536_v12 = vsel %vm476_vm4, %v533_v8, %v535_v61  ;;  %v542_v19 = vrot.slane %v3290_v25, 2  ;;  %v539_v26 = vsel %vm476_vm4, %v537_v39, %v538_v18  ;;  %v4388_v62 = vld [vmem:[#allocation8_spill] sm:$0xff]  ;;  %v4389_v61 = vld [vmem:[#allocation17_spill] sm:$0xff]  ;;  %v4390_v39 = vld [vmem:[#allocation10_spill] sm:$0xff] }
  0x61   : > { %2287 = vrot.lane.b32.xlu1 %v3402_v11, %s2921_s30  ;;  %v543_v44 = vrot.slane %v3297_v41, 2  ;;  %v541_v10 = vsel %vm476_vm4, %v538_v18, %v540_v59  ;;  %v545_v22 = vrot.slane %v3299_v46, 2  ;;  %v2311_v36 = vpack.i.bf16 %v531_v5, %v529_v3  ;;  %v4392_v59 = vld [vmem:[#allocation9_spill] sm:$0xff] }
  0x62   : > { %v3448_v47 = vpack.i.bf16 %v541_v10, %v539_v26  ;;  %v2316_v55 = vpack.i.bf16 %v536_v12, %v534_v2  ;;  %v2331_v46 = vpack.i.bf16 %v3195_v28, %v3193_v27  ;;  %v2336_v8 = vpack.i.bf16 %v4388_v62, %v4387_v34  ;;  %v4391_v28 = vld [vmem:[#allocation6_spill] sm:$0xff]  ;;  %v4398_v62 = vld [vmem:[#allocation19_spill] sm:$0xff] }
  0x63   : > { %2292 = vrot.lane.b32.xlu0 %v3421_v24, %s2921_s30  ;;  %v544_v9 = vsel %vm476_vm4, %v542_v19, %v543_v44  ;;  %v546_v54 = vsel %vm476_vm4, %v543_v44, %v545_v22  ;;  %v2361_v27 = vpack.i.bf16 %v3213_v52, %v3205_v40  ;;  %v2366_v18 = vpack.i.bf16 %v3102_v32, %v4391_v28  ;;  %v258_v40 = vld [vmem:[%s3048_s28 + $0xf0] sm:$0xff]  ;;  %v259_v32 = vld [vmem:[%s3048_s28 + $0xf8] sm:$0xff]  ;;  %s162_s28 = sand.u32 1, %s2909_s13  }
  0x64   : > { %v3456_v33 = vpack.i.bf16 %v546_v54, %v544_v9  ;;  %291 = vst.msk [vmem:[#allocation2 + $0x181] sm:$0xff] %vm182_vm0, %v258_v40  ;;  %292 = vst.msk [vmem:[#allocation2 + $0x189] sm:$0xff] %vm182_vm0, %v259_v32  ;;  %v2421_v52 = vpack.i.bf16 %v3269_v1, %v3247_v30  ;;  %v2481_v30 = vpack.i.bf16 %v3285_v23, %v3277_v7  ;;  %v4397_v34 = vld [vmem:[#allocation18_spill] sm:$0xff]  ;;  %s1979_s29 = sshll.u32 %s162_s28, 6  ;;  %s4289_s10 = scalar_lea.sflag [#allocation4], %s162_s28 }
  0x65   : > { %2297 = vrot.lane.b32.xlu1 %v3424_v51, %s2921_s30  ;;  %v2541_v44 = vpack.i.bf16 %v3297_v41, %v3290_v25 }
  0x67   : > { %2302 = vrot.lane.b32.xlu0 %v3430_v53, %s2921_s30 }
  0x69   : > { %2307 = vrot.lane.b32.xlu1 %v3432_v35, %s2921_s30 }
  0x6b   : > { %2312 = vrot.lane.b32.xlu0 %v2311_v36, %s2921_s30 }
  0x6d   : > { %2317 = vrot.lane.b32.xlu1 %v2316_v55, %s2921_s30 }
  0x6f   : > { %2322 = vrot.lane.b32.xlu0 %v3448_v47, %s2921_s30 }
  0x71   : > { %2327 = vrot.lane.b32.xlu1 %v3456_v33, %s2921_s30 }
  0x73   : > { %2332 = vrot.lane.b32.xlu0 %v2331_v46, %s2922_s4 }
  0x75   : > { %2337 = vrot.lane.b32.xlu1 %v2336_v8, %s2922_s4  ;;  %v2601_v8 = vpack.i.bf16 %v4398_v62, %v4397_v34 }
  0x77   : > { %2342 = vrot.lane.b32.xlu0 %v4389_v61, %s2923_s5 }
  0x79   : > { %2347 = vrot.lane.b32.xlu1 %v4390_v39, %s2923_s5  ;;  %v547_v39 = vrot.slane %v4397_v34, 2 }
  0x7b   : > { %2352 = vrot.lane.b32.xlu0 %v3432_v35, %s2924_s6 }
  0x7d   : > { %2357 = vrot.lane.b32.xlu1 %v3371_v37, %s2924_s6  ;;  %v2426_v37 = vpack.i.bf16 %v3123_v43, %v3121_v42 }
  0x7f   : > { %2362 = vrot.lane.b32.xlu0 %v2361_v27, %s2925_s7 }
  0x81   : > { %2367 = vrot.lane.b32.xlu1 %v2366_v18, %s2925_s7 }
  0x83   : > { %2372 = vrot.lane.b32.xlu0 %v3283_v20, %s2926_s8 }
  0x85   : > { %2377 = vrot.lane.b32.xlu1 %v4392_v59, %s2926_s8 }
  0x87   : > { %2382 = vrot.lane.b32.xlu0 %v2311_v36, %s2927_s9 }
  0x89   : > { %2387 = vrot.lane.b32.xlu1 %v3373_v38, %s2927_s9 }
  0x8b   : > { %2392 = vrot.lane.b32.xlu0 %v2361_v27, %s2922_s4  ;;  %v548_v27 = vrot.slane %v4398_v62, 2 }
  0x8d   : > { %2397 = vrot.lane.b32.xlu1 %v2366_v18, %s2922_s4  ;;  %v2606_v18 = vpack.i.bf16 %v3161_v4, %v3152_v63  ;;  %v4399_v4 = vld [vmem:[#allocation14_spill] sm:$0xff] }
  0x8f   : > { %2402 = vrot.lane.b32.xlu0 %v3283_v20, %s2923_s5  ;;  %v4393_v20 = vld [vmem:[#allocation11_spill] sm:$0xff] }
  0x91   : > { %2407 = vrot.lane.b32.xlu1 %v4392_v59, %s2923_s5  ;;  %v549_v59 = vsel %vm476_vm4, %v547_v39, %v548_v27 }
  0x93   : > { %2412 = vrot.lane.b32.xlu0 %v2311_v36, %s2924_s6 }
  0x95   : > { %2417 = vrot.lane.b32.xlu1 %v3373_v38, %s2924_s6 }
  0x97   : > { %2422 = vrot.lane.b32.xlu0 %v2421_v52, %s2925_s7 }
  0x99   : > { %2427 = vrot.lane.b32.xlu1 %v2426_v37, %s2925_s7 }
  0x9b   : > { %2432 = vrot.lane.b32.xlu0 %v3305_v45, %s2926_s8 }
  0x9d   : > { %2437 = vrot.lane.b32.xlu1 %v4393_v20, %s2926_s8 }
  0x9f   : > { %2442 = vrot.lane.b32.xlu0 %v2316_v55, %s2927_s9 }
  0xa1   : > { %2447 = vrot.lane.b32.xlu1 %v3392_v48, %s2927_s9 }
  0xa3   : > { %2452 = vrot.lane.b32.xlu0 %v2421_v52, %s2922_s4 }
  0xa5   : > { %2457 = vrot.lane.b32.xlu1 %v2426_v37, %s2922_s4  ;;  %v555_v37 = vrot.slane %v3322_v31, 2 }
  0xa7   : > { %2462 = vrot.lane.b32.xlu0 %v3305_v45, %s2923_s5  ;;  %v2486_v45 = vpack.i.bf16 %v3133_v50, %v3131_v49 }
  0xa8   : > { %v3521_v42 = vpop.permute.xlu0 %2182 }
  0xa9   : > { %2467 = vrot.lane.b32.xlu1 %v4393_v20, %s2923_s5  ;;  %v2184_v31 = vunpack.i.l.bf16 %v3521_v42 }
  0xab   : > { %2472 = vrot.lane.b32.xlu0 %v2316_v55, %s2924_s6  ;;  %v3526_v43 = vpop.permute.xlu1 %2192 }
  0xad   : > { %v3530_v1 = vpop.permute.xlu0 %2187  ;;  %2477 = vrot.lane.b32.xlu1 %v3392_v48, %s2924_s6  ;;  %v4394_v48 = vld [vmem:[#allocation12_spill] sm:$0xff] }
  0xaf   : > { %2482 = vrot.lane.b32.xlu0 %v2481_v30, %s2925_s7  ;;  %v3537_v38 = vpop.permute.xlu1 %2197 }
  0xb1   : > { %v3539_v3 = vpop.permute.xlu0 %2202  ;;  %2487 = vrot.lane.b32.xlu1 %v2486_v45, %s2925_s7 }
  0xb3   : > { %2492 = vrot.lane.b32.xlu0 %v3326_v0, %s2926_s8  ;;  %v3544_v7 = vpop.permute.xlu1 %2207 }
  0xb5   : > { %v3546_v23 = vpop.permute.xlu0 %2212  ;;  %2497 = vrot.lane.b32.xlu1 %v4394_v48, %s2926_s8 }
  0xb7   : > { %2502 = vrot.lane.b32.xlu0 %v3448_v47, %s2927_s9  ;;  %v3552_v49 = vpop.permute.xlu1 %2217 }
  0xb9   : > { %v3554_v50 = vpop.permute.xlu0 %2222  ;;  %2507 = vrot.lane.b32.xlu1 %v3400_v15, %s2927_s9 }
  0xba   : > { %v2225_v34 = vunpack.i.h.bf16 %v3554_v50  ;;  %v2224_v62 = vunpack.i.l.bf16 %v3554_v50 }
  0xbb   : > { %2512 = vrot.lane.b32.xlu0 %v2481_v30, %s2922_s4  ;;  %v3559_v5 = vpop.permute.xlu1 %2227  ;;  %v552_v30 = vrot.slane %v3318_v29, 2 }
  0xbd   : > { %v3561_v2 = vpop.permute.xlu0 %2232  ;;  %2517 = vrot.lane.b32.xlu1 %v2486_v45, %s2922_s4  ;;  %v4400_v45 = vld [vmem:[#allocation20_spill] sm:$0xff] }
  0xbf   : > { %2522 = vrot.lane.b32.xlu0 %v3326_v0, %s2923_s5  ;;  %v3566_v12 = vpop.permute.xlu1 %2237  ;;  %v2546_v0 = vpack.i.bf16 %v3144_v57, %v3142_v56 }
  0xc1   : > { %v3568_v19 = vpop.permute.xlu0 %2242  ;;  %2527 = vrot.lane.b32.xlu1 %v4394_v48, %s2923_s5  ;;  %v553_v48 = vrot.slane %v4400_v45, 2 }
  0xc3   : > { %2532 = vrot.lane.b32.xlu0 %v3448_v47, %s2924_s6  ;;  %v3574_v26 = vpop.permute.xlu1 %2247 }
  0xc5   : > { %v3578_v10 = vpop.permute.xlu0 %2252  ;;  %2537 = vrot.lane.b32.xlu1 %v3400_v15, %s2924_s6  ;;  %v4395_v15 = vld [vmem:[#allocation13_spill] sm:$0xff] }
  0xc7   : > { %2542 = vrot.lane.b32.xlu0 %v2541_v44, %s2925_s7  ;;  %v3585_v22 = vpop.permute.xlu1 %2257 }
  0xc9   : > { %v3587_v36 = vpop.permute.xlu0 %2262  ;;  %2547 = vrot.lane.b32.xlu1 %v2546_v0, %s2925_s7 }
  0xca   : > { %v2264_v50 = vunpack.i.l.bf16 %v3587_v36 }
  0xcb   : > { %2552 = vrot.lane.b32.xlu0 %v3338_v17, %s2926_s8  ;;  %v3592_v25 = vpop.permute.xlu1 %2267 }
  0xcd   : > { %v3594_v41 = vpop.permute.xlu0 %2272  ;;  %2557 = vrot.lane.b32.xlu1 %v4395_v15, %s2926_s8 }
  0xcf   : > { %2562 = vrot.lane.b32.xlu0 %v3456_v33, %s2927_s9  ;;  %v3600_v56 = vpop.permute.xlu1 %2277 }
  0xd1   : > { %v3602_v57 = vpop.permute.xlu0 %2282  ;;  %2567 = vrot.lane.b32.xlu1 %v3402_v11, %s2927_s9 }
  0xd3   : > { %2572 = vrot.lane.b32.xlu0 %v2541_v44, %s2922_s4  ;;  %v3607_v47 = vpop.permute.xlu1 %2287 }
  0xd5   : > { %v3609_v55 = vpop.permute.xlu0 %2292  ;;  %2577 = vrot.lane.b32.xlu1 %v2546_v0, %s2922_s4  ;;  %v2185_v0 = vunpack.i.h.bf16 %v3521_v42 }
  0xd7   : > { %2582 = vrot.lane.b32.xlu0 %v3338_v17, %s2923_s5  ;;  %v3614_v9 = vpop.permute.xlu1 %2297  ;;  %v550_v17 = vrot.slane %v3312_v58, 2 }
  0xd8   : > { %4396 = vst [vmem:[#allocation7_spill] sm:$0xff] %v3614_v9 }
  0xd9   : > { %v3616_v54 = vpop.permute.xlu0 %2302  ;;  %2587 = vrot.lane.b32.xlu1 %v4395_v15, %s2923_s5  ;;  %v551_v40 = vsel %vm476_vm4, %v548_v27, %v550_v17  ;;  %v3667_v15 = vpack.i.bf16 %v4400_v45, %v3318_v29  ;;  %v556_v27 = vsel %vm476_vm4, %v553_v48, %v555_v37  ;;  %v2666_v29 = vpack.i.bf16 %v3172_v14, %v3165_v6 }
  0xda   : > { %v2305_v17 = vunpack.i.h.bf16 %v3616_v54  ;;  %v2304_v42 = vunpack.i.l.bf16 %v3616_v54  ;;  %v1368_v6 = vsel %vm182_vm0, %v3185_v21, %v2225_v34  ;;  %v1367_v14 = vsel %vm182_vm0, %v3176_v16, %v2224_v62 }
  0xdb   : > { %2592 = vrot.lane.b32.xlu0 %v3456_v33, %s2924_s6  ;;  %v3622_v46 = vpop.permute.xlu1 %2307 }
  0xdd   : > { %v3629_v28 = vpop.permute.xlu0 %2312  ;;  %2597 = vrot.lane.b32.xlu1 %v3402_v11, %s2924_s6  ;;  %v3647_v11 = vpack.i.bf16 %v551_v40, %v549_v59  ;;  %v2265_v59 = vunpack.i.h.bf16 %v3587_v36 }
  0xdf   : > { %2602 = vrot.lane.b32.xlu0 %v2601_v8, %s2925_s7  ;;  %v3636_v33 = vpop.permute.xlu1 %2317 }
  0xe1   : > { %v3640_v32 = vpop.permute.xlu0 %2322  ;;  %2607 = vrot.lane.b32.xlu1 %v2606_v18, %s2925_s7 }
  0xe3   : > { %2612 = vrot.lane.b32.xlu0 %v3346_v13, %s2926_s8  ;;  %v3645_v58 = vpop.permute.xlu1 %2327 }
  0xe5   : > { %v2333_v63 = vpop.permute.xlu0 %2332  ;;  %2617 = vrot.lane.b32.xlu1 %v4399_v4, %s2926_s8 }
  0xe6   : > { %v2335_v40 = vunpack.i.h.bf16 %v2333_v63  ;;  %v2334_v45 = vunpack.i.l.bf16 %v2333_v63 }
  0xe7   : > { %2622 = vrot.lane.b32.xlu0 %v3647_v11, %s2927_s9  ;;  %v2338_v52 = vpop.permute.xlu1 %2337 }
  0xe8   : > { %v2340_v36 = vunpack.i.h.bf16 %v2338_v52 }
  0xe9   : > { %v3654_v20 = vpop.permute.xlu0 %2342  ;;  %2627 = vrot.lane.b32.xlu1 %v3421_v24, %s2927_s9 }
  0xeb   : > { %2632 = vrot.lane.b32.xlu0 %v2601_v8, %s2922_s4  ;;  %v3661_v44 = vpop.permute.xlu1 %2347  ;;  %v554_v8 = vsel %vm476_vm4, %v552_v30, %v553_v48  ;;  %v2821_v30 = vld [vmem:[#allocation2 + $0x8] sm:$0xff]  ;;  %v2822_v48 = vld [vmem:[#allocation2] sm:$0xff] }
  0xec   : > { %v1352_v37 = vsel %vm182_vm0, %v2821_v30, %v2185_v0  ;;  %v1351_v54 = vsel %vm182_vm0, %v2822_v48, %v2184_v31  ;;  %v3686_v9 = vpack.i.bf16 %v556_v27, %v554_v8  ;;  %v1400_v0 = vsel %vm1383_vm5, %v1367_v14, %v2304_v42 }
  0xed   : > { %v3671_v39 = vpop.permute.xlu0 %2352  ;;  %2637 = vrot.lane.b32.xlu1 %v2606_v18, %s2922_s4  ;;  %v1401_v31 = vsel %vm1383_vm5, %v1368_v6, %v2305_v17  ;;  %v2345_v8 = vunpack.i.h.bf16 %v3654_v20  ;;  %v2344_v27 = vunpack.i.l.bf16 %v3654_v20  ;;  %v1385_v21 = vsel %vm1383_vm5, %v1352_v37, %v2265_v59 }
  0xee   : > { %v1384_v34 = vsel %vm1383_vm5, %v1351_v54, %v2264_v50  ;;  %v1433_v16 = vsel %vm1416_vm6, %v1400_v0, %v2334_v45  ;;  %v2350_v62 = vunpack.i.h.bf16 %v3661_v44  ;;  %v2349_v17 = vunpack.i.l.bf16 %v3661_v44 }
  0xef   : > { %2642 = vrot.lane.b32.xlu0 %v3346_v13, %s2923_s5  ;;  %v2358_v18 = vpop.permute.xlu1 %2357  ;;  %v2339_v13 = vunpack.i.l.bf16 %v2338_v52  ;;  %v1434_v52 = vsel %vm1416_vm6, %v1401_v31, %v2335_v40  ;;  %v2355_v42 = vunpack.i.h.bf16 %v3671_v39  ;;  %v2354_v20 = vunpack.i.l.bf16 %v3671_v39 }
  0xf0   : > { %v1418_v50 = vsel %vm1416_vm6, %v1385_v21, %v2340_v36  ;;  %v2360_v30 = vunpack.i.h.bf16 %v2358_v18  ;;  %v2359_v45 = vunpack.i.l.bf16 %v2358_v18  ;;  %v1466_v40 = vsel %vm1449_vm7, %v1433_v16, %v2344_v27 }
  0xf1   : > { %v2363_v63 = vpop.permute.xlu0 %2362  ;;  %2647 = vrot.lane.b32.xlu1 %v4399_v4, %s2923_s5  ;;  %v1417_v59 = vsel %vm1416_vm6, %v1384_v34, %v2339_v13  ;;  %v1467_v48 = vsel %vm1449_vm7, %v1434_v52, %v2345_v8  ;;  %v1451_v13 = vsel %vm1449_vm7, %v1418_v50, %v2350_v62 }
  0xf2   : > { %v2365_v54 = vunpack.i.h.bf16 %v2363_v63  ;;  %v2364_v44 = vunpack.i.l.bf16 %v2363_v63  ;;  %v1450_v18 = vsel %vm1449_vm7, %v1417_v59, %v2349_v17  ;;  %v1500_v31 = vsel %vm1482_vm8, %v1467_v48, %v2355_v42  ;;  %v341_v48 = vld [vmem:[#allocation2 + $0x180] sm:$0xff] }
  0xf3   : > { %2652 = vrot.lane.b32.xlu0 %v3647_v11, %s2924_s6  ;;  %v2368_v4 = vpop.permute.xlu1 %2367  ;;  %v1483_v8 = vsel %vm1482_vm8, %v1450_v18, %v2359_v45  ;;  %v1484_v63 = vsel %vm1482_vm8, %v1451_v13, %v2360_v30 }
  0xf4   : > { %v2370_v6 = vunpack.i.h.bf16 %v2368_v4  ;;  %v2369_v14 = vunpack.i.l.bf16 %v2368_v4  ;;  %v1533_v17 = vsel %vm1515_vm9, %v1500_v31, %v2365_v54  ;;  %v342_v54 = vld [vmem:[#allocation2 + $0x188] sm:$0xff] }
  0xf5   : > { %v2373_v37 = vpop.permute.xlu0 %2372  ;;  %2657 = vrot.lane.b32.xlu1 %v3421_v24, %s2924_s6  ;;  %v1499_v24 = vsel %vm1482_vm8, %v1466_v40, %v2354_v20 }
  0xf6   : > { %v2375_v0 = vunpack.i.h.bf16 %v2373_v37  ;;  %v2374_v39 = vunpack.i.l.bf16 %v2373_v37  ;;  %v1532_v4 = vsel %vm1515_vm9, %v1499_v24, %v2364_v44  ;;  %v1516_v62 = vsel %vm1515_vm9, %v1483_v8, %v2369_v14  ;;  %v343_v44 = vld [vmem:[#allocation2 + $0x190] sm:$0x3] }
  0xf7   : > { %2662 = vrot.lane.b32.xlu0 %v3667_v15, %s2925_s7  ;;  %v2378_v36 = vpop.permute.xlu1 %2377  ;;  %v1517_v20 = vsel %vm1515_vm9, %v1484_v63, %v2370_v6  ;;  %v560_v8 = vrot.slane %v341_v48, 1  ;;  %v561_v63 = vrot.slane %v342_v54, 1 }
  0xf8   : > { %v2380_v27 = vunpack.i.h.bf16 %v2378_v36  ;;  %v2379_v21 = vunpack.i.l.bf16 %v2378_v36  ;;  %v1565_v59 = vsel %vm1548_vm10, %v1532_v4, %v2374_v39  ;;  %v1566_v50 = vsel %vm1548_vm10, %v1533_v17, %v2375_v0  ;;  %v4403_v39 = vld [vmem:[#allocation15_spill] sm:$0xff] }
  0xf9   : > { %v2383_v34 = vpop.permute.xlu0 %2382  ;;  %2667 = vrot.lane.b32.xlu1 %v2666_v29, %s2925_s7  ;;  %v562_v17 = vsel %vm395_vm3, %v560_v8, %v561_v63 }
  0xfa   : > { %v2385_v16 = vunpack.i.h.bf16 %v2383_v34  ;;  %v2384_v52 = vunpack.i.l.bf16 %v2383_v34  ;;  %v1549_v6 = vsel %vm1548_vm10, %v1516_v62, %v2379_v21  ;;  %v1550_v14 = vsel %vm1548_vm10, %v1517_v20, %v2380_v27  ;;  %v2823_v34 = vld [vmem:[#allocation2 + $0xa8] sm:$0xff] }
  0xfb   : > { %2672 = vrot.lane.b32.xlu0 %v3357_v60, %s2926_s8  ;;  %v2388_v42 = vpop.permute.xlu1 %2387  ;;  %v563_v27 = vrot.slane %v343_v44, 1  ;;  %v565_v20 = vrot.slane %v341_v48, 2 }
  0xfc   : > { %v2390_v30 = vunpack.i.h.bf16 %v2388_v42  ;;  %v2389_v45 = vunpack.i.l.bf16 %v2388_v42  ;;  %v1598_v37 = vsel %vm1581_vm12, %v1565_v59, %v2384_v52  ;;  %v1599_v40 = vsel %vm1581_vm12, %v1566_v50, %v2385_v16  ;;  %v2824_v16 = vld [vmem:[#allocation2 + $0xb0] sm:$0xff] }
  0xfd   : > { %v3741_v0 = vpop.permute.xlu0 %2392  ;;  %2677 = vrot.lane.b32.xlu1 %v4403_v39, %s2926_s8  ;;  %v2068_v36 = vpack.c.bf16 %v1599_v40, %v1598_v37  ;;  %v2701_v52 = vpack.i.bf16 %v2824_v16, %v2823_v34  ;;  %v564_v62 = vsel %vm395_vm3, %v561_v63, %v563_v27  ;;  %v2190_v42 = vunpack.i.h.bf16 %v3530_v1  ;;  %v2828_v63 = vld [vmem:[#allocation2 + $0x18] sm:$0xff] }
  0xfe   : > { %v1582_v18 = vsel %vm1581_vm12, %v1549_v6, %v2389_v45  ;;  %v1583_v13 = vsel %vm1581_vm12, %v1550_v14, %v2390_v30  ;;  %v2189_v59 = vunpack.i.l.bf16 %v3530_v1  ;;  %v566_v50 = vrot.slane %v342_v54, 2  ;;  %v2825_v6 = vld [vmem:[#allocation2 + $0xc0] sm:$0xff]  ;;  %v2826_v14 = vld [vmem:[#allocation2 + $0xc8] sm:$0xff]  ;;  %v3802_v16 = vld [vmem:[#allocation2 + $0xd8] sm:$0xff] }
  0xff   : > { %2682 = vrot.lane.b32.xlu0 %v3686_v9, %s2927_s9  ;;  %2070 = vmatprep.subr.msk.bf16.mxu0 %vm3733_vm13, %v2068_v36  ;;  %v3751_v24 = vpop.permute.xlu1 %2397  ;;  %v2071_v31 = vpack.c.bf16 %v1583_v13, %v1582_v18  ;;  %v568_v30 = vrot.slane %v343_v44, 2  ;;  %v2230_v45 = vunpack.i.h.bf16 %v3559_v5  ;;  %v2229_v37 = vunpack.i.l.bf16 %v3559_v5 }
 0x100   : > { %2116 = vmatprep.subr.msk.bf16.mxu1 %vm3733_vm13, %v2068_v36  ;;  %v3779_v36 = vpack.i.bf16 %v2826_v14, %v2825_v6  ;;  %v2310_v18 = vunpack.i.h.bf16 %v3622_v46  ;;  %v2309_v1 = vunpack.i.l.bf16 %v3622_v46  ;;  %v3783_v44 = vpack.i.bf16 %v564_v62, %v562_v17 }
 0x101   : > { %v3755_v21 = vpop.permute.xlu0 %2402  ;;  %2687 = vrot.lane.b32.xlu1 %v3424_v51, %s2927_s9  ;;  %2073 = vmatpush3.bf16.xpose.msk.msra.mxu0 %vm3733_vm13, %v2071_v31  ;;  %v2270_v13 = vunpack.i.h.bf16 %v3592_v25  ;;  %v2269_v5 = vunpack.i.l.bf16 %v3592_v25  ;;  %v1353_v27 = vsel %vm182_vm0, %v2828_v63, %v2189_v59  ;;  %v3793_v46 = vsel %vm476_vm4, %v565_v20, %v566_v50  ;;  %v3798_v25 = vld [vmem:[#allocation2 + $0xe0] sm:$0xff] }
 0x102   : > { %2124 = vmatpush3.bf16.xpose.msk.msra.mxu1 %vm3733_vm13, %v2071_v31  ;;  %v2395_v31 = vunpack.i.h.bf16 %v3741_v0  ;;  %v3796_v34 = vsel %vm476_vm4, %v566_v50, %v568_v30  ;;  %v2400_v17 = vunpack.i.h.bf16 %v3751_v24  ;;  %v2399_v62 = vunpack.i.l.bf16 %v3751_v24 }
 0x103   : > { %2692 = vrot.lane.b32.xlu0 %v3647_v11, %s2921_s30  ;;  %v3765_v4 = vpop.permute.xlu1 %2407  ;;  %v3777_v11 = vpack.i.bf16 %v342_v54, %v341_v48  ;;  %v2827_v54 = vld [vmem:[#allocation2 + $0x20] sm:$0xff]  ;;  %v2405_v50 = vunpack.i.h.bf16 %v3755_v21  ;;  %v2404_v30 = vunpack.i.l.bf16 %v3755_v21 }
 0x104   : > { %v1354_v8 = vsel %vm182_vm0, %v2827_v54, %v2190_v42  ;;  %v2410_v14 = vunpack.i.h.bf16 %v3765_v4 }
 0x105   : > { %v3773_v40 = vpop.permute.xlu0 %2412  ;;  %2697 = vrot.lane.b32.xlu1 %v3667_v15, %s2922_s4  ;;  %v2394_v15 = vunpack.i.l.bf16 %v3741_v0  ;;  %v1370_v0 = vsel %vm182_vm0, %v3798_v25, %v2230_v45  ;;  %v1386_v45 = vsel %vm1383_vm5, %v1353_v27, %v2269_v5 }
 0x106   : > { %v1403_v20 = vsel %vm1383_vm5, %v1370_v0, %v2310_v18  ;;  %v2409_v18 = vunpack.i.l.bf16 %v3765_v4  ;;  %v2414_v21 = vunpack.i.l.bf16 %v3773_v40  ;;  %v1419_v5 = vsel %vm1416_vm6, %v1386_v45, %v2399_v62 }
 0x107   : > { %2702 = vrot.lane.b32.xlu0 %v2701_v52, %s2922_s4  ;;  %v2418_v48 = vpop.permute.xlu1 %2417  ;;  %v1369_v52 = vsel %vm182_vm0, %v3802_v16, %v2229_v37  ;;  %v1387_v37 = vsel %vm1383_vm5, %v1354_v8, %v2270_v13  ;;  %v1436_v6 = vsel %vm1416_vm6, %v1403_v20, %v2395_v31 }
 0x108   : > { %v1402_v59 = vsel %vm1383_vm5, %v1369_v52, %v2309_v1  ;;  %v2415_v1 = vunpack.i.h.bf16 %v3773_v40  ;;  %v1420_v13 = vsel %vm1416_vm6, %v1387_v37, %v2400_v17  ;;  %v2420_v54 = vunpack.i.h.bf16 %v2418_v48 }
 0x109   : > { %v2423_v42 = vpop.permute.xlu0 %2422  ;;  %2707 = vrot.lane.b32.xlu1 %v3357_v60, %s2923_s5  ;;  %v1435_v24 = vsel %vm1416_vm6, %v1402_v59, %v2394_v15  ;;  %v2419_v31 = vunpack.i.l.bf16 %v2418_v48  ;;  %v1469_v15 = vsel %vm1449_vm7, %v1436_v6, %v2405_v50  ;;  %v1452_v48 = vsel %vm1449_vm7, %v1419_v5, %v2409_v18 }
 0x10a   : > { %v2425_v63 = vunpack.i.h.bf16 %v2423_v42  ;;  %v2424_v4 = vunpack.i.l.bf16 %v2423_v42  ;;  %v1453_v62 = vsel %vm1449_vm7, %v1420_v13, %v2410_v14  ;;  %v1502_v59 = vsel %vm1482_vm8, %v1469_v15, %v2415_v1 }
 0x10b   : > { %2712 = vrot.lane.b32.xlu0 %v4403_v39, %s2923_s5  ;;  %v2428_v60 = vpop.permute.xlu1 %2427  ;;  %v1468_v39 = vsel %vm1449_vm7, %v1435_v24, %v2404_v30  ;;  %v1485_v50 = vsel %vm1482_vm8, %v1452_v48, %v2419_v31  ;;  %v1486_v42 = vsel %vm1482_vm8, %v1453_v62, %v2420_v54  ;;  %v346_v48 = vld [vmem:[#allocation2 + $0x1a8] sm:$0x3] }
 0x10c   : > { %v2430_v27 = vunpack.i.h.bf16 %v2428_v60  ;;  %v2429_v0 = vunpack.i.l.bf16 %v2428_v60  ;;  %v1501_v20 = vsel %vm1482_vm8, %v1468_v39, %v2414_v21  ;;  %v1535_v6 = vsel %vm1515_vm9, %v1502_v59, %v2425_v63 }
 0x10d   : > { %v2433_v8 = vpop.permute.xlu0 %2432  ;;  %2717 = vrot.lane.b32.xlu1 %v3686_v9, %s2924_s6 }
 0x10e   : > { %v2435_v52 = vunpack.i.h.bf16 %v2433_v8  ;;  %v2434_v40 = vunpack.i.l.bf16 %v2433_v8  ;;  %v1518_v14 = vsel %vm1515_vm9, %v1485_v50, %v2429_v0  ;;  %v1519_v18 = vsel %vm1515_vm9, %v1486_v42, %v2430_v27 }
 0x10f   : > { %2722 = vrot.lane.b32.xlu0 %v3424_v51, %s2924_s6  ;;  %v2438_v17 = vpop.permute.xlu1 %2437  ;;  %v1534_v51 = vsel %vm1515_vm9, %v1501_v20, %v2424_v4  ;;  %v3858_v27 = vpack.i.bf16 %v3796_v34, %v3793_v46  ;;  %v4404_v20 = vld [vmem:[#allocation16_spill] sm:$0xff]  ;;  %v576_v42 = vrot.slane %v346_v48, 1 }
 0x110   : > { %v2440_v30 = vunpack.i.h.bf16 %v2438_v17  ;;  %v2439_v45 = vunpack.i.l.bf16 %v2438_v17  ;;  %v1567_v1 = vsel %vm1548_vm10, %v1534_v51, %v2434_v40  ;;  %v1568_v21 = vsel %vm1548_vm10, %v1535_v6, %v2435_v52  ;;  %v3862_v40 = vld [vmem:[#allocation2 + $0x198] sm:$0xff]  ;;  %v3864_v17 = vld [vmem:[#allocation2 + $0x1a0] sm:$0xff] }
 0x111   : > { %v2443_v37 = vpop.permute.xlu0 %2442  ;;  %2727 = vrot.lane.b32.xlu1 %v3777_v11, %s2925_s7  ;;  %v574_v34 = vrot.slane %v3864_v17, 1  ;;  %v573_v50 = vrot.slane %v3862_v40, 1  ;;  %v579_v51 = vrot.slane %v3864_v17, 2  ;;  %v2791_v6 = vpack.i.bf16 %v3864_v17, %v3862_v40 }
 0x112   : > { %v2445_v24 = vunpack.i.h.bf16 %v2443_v37  ;;  %v2444_v60 = vunpack.i.l.bf16 %v2443_v37  ;;  %v1551_v39 = vsel %vm1548_vm10, %v1518_v14, %v2439_v45  ;;  %v1552_v15 = vsel %vm1548_vm10, %v1519_v18, %v2440_v30 }
 0x113   : > { %2732 = vrot.lane.b32.xlu0 %v3779_v36, %s2925_s7  ;;  %v2448_v5 = vpop.permute.xlu1 %2447  ;;  %v2195_v30 = vunpack.i.h.bf16 %v3526_v43  ;;  %v2194_v45 = vunpack.i.l.bf16 %v3526_v43  ;;  %v2235_v14 = vunpack.i.h.bf16 %v3561_v2  ;;  %v2234_v43 = vunpack.i.l.bf16 %v3561_v2 }
 0x114   : > { %v1600_v13 = vsel %vm1581_vm12, %v1567_v1, %v2444_v60  ;;  %v1601_v54 = vsel %vm1581_vm12, %v1568_v21, %v2445_v24  ;;  %v2450_v31 = vunpack.i.h.bf16 %v2448_v5  ;;  %v2449_v8 = vunpack.i.l.bf16 %v2448_v5  ;;  %v2831_v5 = vld [vmem:[#allocation2 + $0x38] sm:$0xff] }
 0x115   : > { %v2074_v63 = vpack.c.bf16 %v1601_v54, %v1600_v13  ;;  %v3852_v4 = vpop.permute.xlu0 %2452  ;;  %2737 = vrot.lane.b32.xlu1 %v3783_v44, %s2926_s8  ;;  %v578_v24 = vrot.slane %v3862_v40, 2  ;;  %v581_v60 = vrot.slane %v346_v48, 2  ;;  %v3901_v1 = vsel %vm395_vm3, %v573_v50, %v574_v34  ;;  %v2832_v54 = vld [vmem:[#allocation2 + $0x30] sm:$0xff]  ;;  %v3983_v40 = vld [vmem:[%s4340_s1] sm:$0xff] }
 0x116   : > { %v1584_v0 = vsel %vm1581_vm12, %v1551_v39, %v2449_v8  ;;  %v1585_v52 = vsel %vm1581_vm12, %v1552_v15, %v2450_v31  ;;  %v3904_v21 = vsel %vm395_vm3, %v574_v34, %v576_v42  ;;  %v1356_v13 = vsel %vm182_vm0, %v2831_v5, %v2195_v30  ;;  %2060 = vmatprep.mubr.msk.f32.mxu0 %vm1618_vm11, %v3983_v40 }
 0x117   : > { %v2077_v62 = vpack.c.bf16 %v1585_v52, %v1584_v0  ;;  %2742 = vrot.lane.b32.xlu0 %v4404_v20, %s2926_s8  ;;  %2076 = vmatprep.subr.msk.bf16.mxu0 %vm3733_vm13, %v2074_v63  ;;  %v3870_v59 = vpop.permute.xlu1 %2457  ;;  %v1355_v31 = vsel %vm182_vm0, %v2832_v54, %v2194_v45  ;;  %v2315_v8 = vunpack.i.h.bf16 %v3629_v28  ;;  %v2314_v2 = vunpack.i.l.bf16 %v3629_v28 }
 0x118   : > { %2117 = vmatprep.subr.msk.bf16.mxu1 %vm3733_vm13, %v2074_v63  ;;  %v2275_v39 = vunpack.i.h.bf16 %v3594_v41  ;;  %v2455_v15 = vunpack.i.h.bf16 %v3852_v4  ;;  %v2454_v63 = vunpack.i.l.bf16 %v3852_v4  ;;  %v2796_v52 = vpack.i.bf16 %v3798_v25, %v3802_v16  ;;  %v2834_v4 = vld [vmem:[#allocation2 + $0xf0] sm:$0xff] }
 0x119   : > { %v3874_v46 = vpop.permute.xlu0 %2462  ;;  %2747 = vrot.lane.b32.xlu1 %v3858_v27, %s2927_s9  ;;  %2079 = vmatpush3.bf16.xpose.msk.msra.mxu0 %vm3733_vm13, %v2077_v62  ;;  %v2801_v48 = vpack.i.bf16 %v3904_v21, %v3901_v1  ;;  %v3921_v28 = vsel %vm476_vm4, %v578_v24, %v579_v51  ;;  %v1371_v50 = vsel %vm182_vm0, %v2834_v4, %v2234_v43  ;;  %v2459_v42 = vunpack.i.l.bf16 %v3870_v59 }
 0x11a   : > { %2125 = vmatpush3.bf16.xpose.msk.msra.mxu1 %vm3733_vm13, %v2077_v62  ;;  %v3924_v62 = vsel %vm476_vm4, %v579_v51, %v581_v60  ;;  %v1404_v45 = vsel %vm1383_vm5, %v1371_v50, %v2314_v2  ;;  %v2465_v51 = vunpack.i.h.bf16 %v3874_v46  ;;  %v2464_v60 = vunpack.i.l.bf16 %v3874_v46 }
 0x11b   : > { %2752 = vrot.lane.b32.xlu0 %v3430_v53, %s2927_s9  ;;  %v3888_v37 = vpop.permute.xlu1 %2467  ;;  %v1437_v5 = vsel %vm1416_vm6, %v1404_v45, %v2454_v63  ;;  %v2811_v16 = vpack.i.bf16 %v3924_v62, %v3921_v28  ;;  %v2200_v21 = vunpack.i.h.bf16 %v3537_v38  ;;  %v4011_v28 = vld [vmem:[%s4340_s1 + $0x10] sm:$0xff]  ;;  %v2239_v62 = vunpack.i.l.bf16 %v3566_v12 }
 0x11c   : > { %v2470_v54 = vunpack.i.h.bf16 %v3888_v37  ;;  %2064 = vmatprep.mubr.msk.f32.mxu1 %vm1618_vm11, %v4011_v28 }
 0x11d   : > { %v3896_v18 = vpop.permute.xlu0 %2472  ;;  %2757 = vrot.lane.b32.xlu1 %v3686_v9, %s2921_s30  ;;  %v2274_v9 = vunpack.i.l.bf16 %v3594_v41  ;;  %v2833_v41 = vld [vmem:[#allocation2 + $0xf8] sm:$0xff]  ;;  %s4268_s30 = scalar_lea.vmem [#allocation3], %s1979_s29 }
 0x11e   : > { %v1372_v34 = vsel %vm182_vm0, %v2833_v41, %v2235_v14  ;;  %v1389_v14 = vsel %vm1383_vm5, %v1356_v13, %v2275_v39  ;;  %v2475_v2 = vunpack.i.h.bf16 %v3896_v18  ;;  %v2474_v46 = vunpack.i.l.bf16 %v3896_v18 }
 0x11f   : > { %2762 = vrot.lane.b32.xlu0 %v3777_v11, %s2922_s4  ;;  %v2478_v0 = vpop.permute.xlu1 %2477  ;;  %v2460_v11 = vunpack.i.h.bf16 %v3870_v59  ;;  %v1405_v24 = vsel %vm1383_vm5, %v1372_v34, %v2315_v8  ;;  %v1388_v43 = vsel %vm1383_vm5, %v1355_v31, %v2274_v9  ;;  %v2469_v8 = vunpack.i.l.bf16 %v3888_v37 }
 0x120   : > { %v1438_v59 = vsel %vm1416_vm6, %v1405_v24, %v2455_v15  ;;  %v1421_v13 = vsel %vm1416_vm6, %v1388_v43, %v2459_v42  ;;  %v2480_v39 = vunpack.i.h.bf16 %v2478_v0  ;;  %v2479_v9 = vunpack.i.l.bf16 %v2478_v0 }
 0x121   : > { %v2483_v30 = vpop.permute.xlu0 %2482  ;;  %2767 = vrot.lane.b32.xlu1 %v3779_v36, %s2922_s4  ;;  %v1422_v31 = vsel %vm1416_vm6, %v1389_v14, %v2460_v11  ;;  %v1471_v15 = vsel %vm1449_vm7, %v1438_v59, %v2465_v51  ;;  %v1454_v0 = vsel %vm1449_vm7, %v1421_v13, %v2469_v8  ;;  %s2027_s4 = sshll.u32 %s2971_s16, 10  ;;  %s2928_s16 = smov [#allocation3]  }
 0x122   : > { %v2485_v41 = vunpack.i.h.bf16 %v2483_v30  ;;  %v2484_v37 = vunpack.i.l.bf16 %v2483_v30  ;;  %v1455_v42 = vsel %vm1449_vm7, %v1422_v31, %v2470_v54  ;;  %v1504_v45 = vsel %vm1482_vm8, %v1471_v15, %v2475_v2  ;;  %s2859_s17 = sshll.u32 %s2928_s16, 4  ;;  %s2860_s17 = int_to_ptr.vmem [resolvable:$false] %s2859_s17 }
 0x123   : > { %2772 = vrot.lane.b32.xlu0 %v3783_v44, %s2923_s5  ;;  %v2488_v36 = vpop.permute.xlu1 %2487  ;;  %v1470_v44 = vsel %vm1449_vm7, %v1437_v5, %v2464_v60  ;;  %v1487_v24 = vsel %vm1482_vm8, %v1454_v0, %v2479_v9  ;;  %v1488_v30 = vsel %vm1482_vm8, %v1455_v42, %v2480_v39  ;;  %v2835_v42 = vld [vmem:[#allocation2 + $0x50] sm:$0xff]  ;;  %s2861_s19 = scalar_lea.vmem %s2860_s17, 2048 }
 0x124   : > { %v2490_v34 = vunpack.i.h.bf16 %v2488_v36  ;;  %v2489_v4 = vunpack.i.l.bf16 %v2488_v36  ;;  %v1537_v43 = vsel %vm1515_vm9, %v1504_v45, %v2485_v41  ;;  %v2837_v45 = vld [vmem:[#allocation2 + $0x110] sm:$0xff] }
 0x125   : > { %v2493_v63 = vpop.permute.xlu0 %2492  ;;  %2777 = vrot.lane.b32.xlu1 %v4404_v20, %s2923_s5  ;;  %v1503_v20 = vsel %vm1482_vm8, %v1470_v44, %v2474_v46 }
 0x126   : > { %v2495_v50 = vunpack.i.h.bf16 %v2493_v63  ;;  %v2494_v18 = vunpack.i.l.bf16 %v2493_v63  ;;  %v1520_v36 = vsel %vm1515_vm9, %v1487_v24, %v2489_v4  ;;  %v1521_v54 = vsel %vm1515_vm9, %v1488_v30, %v2490_v34  ;;  %v2838_v30 = vld [vmem:[#allocation2 + $0x108] sm:$0xff] }
 0x127   : > { %2782 = vrot.lane.b32.xlu0 %v3858_v27, %s2924_s6  ;;  %v2498_v11 = vpop.permute.xlu1 %2497  ;;  %v1536_v27 = vsel %vm1515_vm9, %v1503_v20, %v2484_v37  ;;  %v2320_v34 = vunpack.i.h.bf16 %v3636_v33  ;;  %v2280_v4 = vunpack.i.h.bf16 %v3600_v56  ;;  %v2836_v20 = vld [vmem:[#allocation2 + $0x48] sm:$0xff] }
 0x128   : > { %v2500_v51 = vunpack.i.h.bf16 %v2498_v11  ;;  %v2499_v60 = vunpack.i.l.bf16 %v2498_v11  ;;  %v1569_v8 = vsel %vm1548_vm10, %v1536_v27, %v2494_v18  ;;  %v1570_v2 = vsel %vm1548_vm10, %v1537_v43, %v2495_v50 }
 0x129   : > { %v2503_v14 = vpop.permute.xlu0 %2502  ;;  %2787 = vrot.lane.b32.xlu1 %v3430_v53, %s2924_s6  ;;  %v2279_v50 = vunpack.i.l.bf16 %v3600_v56  ;;  %s1885_s6 = sshll.u32 %s4268_s30, 4  ;;  %s4285_s6 = int_to_ptr.vmem [resolvable:$true] %s1885_s6 }
 0x12a   : > { %v2505_v5 = vunpack.i.h.bf16 %v2503_v14  ;;  %v2504_v59 = vunpack.i.l.bf16 %v2503_v14  ;;  %v1553_v9 = vsel %vm1548_vm10, %v1520_v36, %v2499_v60  ;;  %v1554_v63 = vsel %vm1548_vm10, %v1521_v54, %v2500_v51  ;;  %s2855_s11 = scalar_lea.vmem %s4285_s6, 1024  ;;  %p2862_p0 = scmp.lt.s32.totalorder %s4285_s6, %s2860_s17 }
 0x12b   : > { %2792 = vrot.lane.b32.xlu0 %v2791_v6, %s2925_s7  ;;  %v2508_v53 = vpop.permute.xlu1 %2507  ;;  %v1373_v51 = vsel %vm182_vm0, %v2838_v30, %v2239_v62  ;;  %p2856_p11 = scmp.ne.s32.totalorder %s4285_s6, %s2855_s11  ;;  %p2863_p1 = scmp.lt.s32.totalorder %s2861_s19, %s2855_s11 }
 0x12c   : > { %v1602_v46 = vsel %vm1581_vm12, %v1569_v8, %v2504_v59  ;;  %v1603_v13 = vsel %vm1581_vm12, %v1570_v2, %v2505_v5  ;;  %v2510_v31 = vunpack.i.h.bf16 %v2508_v53  ;;  %v2509_v39 = vunpack.i.l.bf16 %v2508_v53 }
 0x12d   : > { %v2080_v44 = vpack.c.bf16 %v1603_v13, %v1602_v46  ;;  %v2513_v15 = vpop.permute.xlu0 %2512  ;;  %2797 = vrot.lane.b32.xlu1 %v2796_v52, %s2925_s7  ;;  %p2857_p12 = pnand %p2856_p11, %p2988_p5  ;;  %p2864_p2 = por %p2863_p1, %p2862_p0 }
 0x12e   : > { %v1586_v17 = vsel %vm1581_vm12, %v1553_v9, %v2509_v39  ;;  %v1587_v6 = vsel %vm1581_vm12, %v1554_v63, %v2510_v31  ;;  %v2515_v18 = vunpack.i.h.bf16 %v2513_v15  ;;  %v2514_v11 = vunpack.i.l.bf16 %v2513_v15 }
 0x12f   : > { %v2083_v41 = vpack.c.bf16 %v1587_v6, %v1586_v17  ;;  %2802 = vrot.lane.b32.xlu0 %v2801_v48, %s2926_s8  ;;  %2082 = vmatprep.subr.msk.bf16.mxu0 %vm3733_vm13, %v2080_v44  ;;  %v2518_v25 = vpop.permute.xlu1 %2517  ;;  %v2199_v48 = vunpack.i.l.bf16 %v3537_v38  ;;  %v2319_v38 = vunpack.i.l.bf16 %v3636_v33  ;;  %p2858_p13 = pneg %p2857_p12 }
 0x130   : > { %2118 = vmatprep.subr.msk.bf16.mxu1 %vm3733_vm13, %v2080_v44  ;;  %v2520_v33 = vunpack.i.h.bf16 %v2518_v25  ;;  %v2519_v60 = vunpack.i.l.bf16 %v2518_v25 }
 0x131   : > { %v2523_v52 = vpop.permute.xlu0 %2522  ;;  %2807 = vrot.lane.b32.xlu1 %v4389_v61, %s2926_s8  ;;  %2085 = vmatpush3.bf16.xpose.msk.msra.mxu0 %vm3733_vm13, %v2083_v41  ;;  %v2240_v61 = vunpack.i.h.bf16 %v3566_v12  ;;  %v1358_v12 = vsel %vm182_vm0, %v2835_v42, %v2200_v21  ;;  %v1406_v27 = vsel %vm1383_vm5, %v1373_v51, %v2319_v38  ;;  %p2865_p3 = pnand %p2864_p2, %p2858_p13 }
 0x132   : > { %2126 = vmatpush3.bf16.xpose.msk.msra.mxu1 %vm3733_vm13, %v2083_v41  ;;  %v2525_v43 = vunpack.i.h.bf16 %v2523_v52  ;;  %v2524_v5 = vunpack.i.l.bf16 %v2523_v52  ;;  %v1391_v59 = vsel %vm1383_vm5, %v1358_v12, %v2280_v4  ;;  %v1439_v8 = vsel %vm1416_vm6, %v1406_v27, %v2514_v11 }
 0x133   : > { %2812 = vrot.lane.b32.xlu0 %v2811_v16, %s2927_s9  ;;  %v2528_v1 = vpop.permute.xlu1 %2527  ;;  %v1374_v24 = vsel %vm182_vm0, %v2837_v45, %v2240_v61  ;;  %v1424_v39 = vsel %vm1416_vm6, %v1391_v59, %v2520_v33 }
 0x134   : > { %v1407_v56 = vsel %vm1383_vm5, %v1374_v24, %v2320_v34  ;;  %v2530_v53 = vunpack.i.h.bf16 %v2528_v1  ;;  %v2529_v46 = vunpack.i.l.bf16 %v2528_v1  ;;  %v1472_v17 = vsel %vm1449_vm7, %v1439_v8, %v2524_v5 }
 0x135   : > { %v2533_v37 = vpop.permute.xlu0 %2532  ;;  %2817 = vrot.lane.b32.xlu1 %v3432_v35, %s2927_s9  ;;  %v1357_v35 = vsel %vm182_vm0, %v2836_v20, %v2199_v48  ;;  %v1440_v54 = vsel %vm1416_vm6, %v1407_v56, %v2515_v18  ;;  %s4283_s9 = scalar_lea.hbm %s4341_s2, %s2027_s4 }
 0x136   : > { %v1390_v36 = vsel %vm1383_vm5, %v1357_v35, %v2279_v50  ;;  %v2535_v13 = vunpack.i.h.bf16 %v2533_v37  ;;  %v2534_v31 = vunpack.i.l.bf16 %v2533_v37  ;;  %v1473_v6 = vsel %vm1449_vm7, %v1440_v54, %v2525_v43 }
 0x137   : > { %v2538_v0 = vpop.permute.xlu1 %2537  ;;  %v1423_v9 = vsel %vm1416_vm6, %v1390_v36, %v2519_v60  ;;  %v1457_v62 = vsel %vm1449_vm7, %v1424_v39, %v2530_v53  ;;  %v2245_v39 = vunpack.i.h.bf16 %v3568_v19 }
 0x138   : > { %v2540_v63 = vunpack.i.h.bf16 %v2538_v0  ;;  %v2539_v44 = vunpack.i.l.bf16 %v2538_v0  ;;  %v1456_v61 = vsel %vm1449_vm7, %v1423_v9, %v2529_v46  ;;  %v1505_v37 = vsel %vm1482_vm8, %v1472_v17, %v2534_v31 }
 0x139   : > { %v2543_v14 = vpop.permute.xlu0 %2542  ;;  %v1506_v34 = vsel %vm1482_vm8, %v1473_v6, %v2535_v13  ;;  %v2205_v13 = vunpack.i.h.bf16 %v3539_v3  ;;  %v2204_v31 = vunpack.i.l.bf16 %v3539_v3  ;;  %v2244_v9 = vunpack.i.l.bf16 %v3568_v19  ;;  %v2840_v3 = vld [vmem:[#allocation2 + $0x60] sm:$0xff] }
 0x13a   : > { %v2545_v41 = vunpack.i.h.bf16 %v2543_v14  ;;  %v2544_v25 = vunpack.i.l.bf16 %v2543_v14  ;;  %v1489_v38 = vsel %vm1482_vm8, %v1456_v61, %v2539_v44  ;;  %v1490_v4 = vsel %vm1482_vm8, %v1457_v62, %v2540_v63  ;;  %v2842_v61 = vld [vmem:[#allocation2 + $0x120] sm:$0xff] }
 0x13b   : > { %v2548_v2 = vpop.permute.xlu1 %2547  ;;  %v2325_v44 = vunpack.i.h.bf16 %v3640_v32  ;;  %v2285_v17 = vunpack.i.h.bf16 %v3602_v57  ;;  %v2284_v6 = vunpack.i.l.bf16 %v3602_v57  ;;  %v1375_v62 = vsel %vm182_vm0, %v2842_v61, %v2244_v9 }
 0x13c   : > { %v2550_v16 = vunpack.i.h.bf16 %v2548_v2  ;;  %v2549_v52 = vunpack.i.l.bf16 %v2548_v2  ;;  %v1538_v0 = vsel %vm1515_vm9, %v1505_v37, %v2544_v25  ;;  %v1539_v42 = vsel %vm1515_vm9, %v1506_v34, %v2545_v41 }
 0x13d   : > { %v2553_v15 = vpop.permute.xlu0 %2552 }
 0x13e   : > { %v2555_v21 = vunpack.i.h.bf16 %v2553_v15  ;;  %v2554_v48 = vunpack.i.l.bf16 %v2553_v15  ;;  %v1522_v35 = vsel %vm1515_vm9, %v1489_v38, %v2549_v52  ;;  %v1523_v45 = vsel %vm1515_vm9, %v1490_v4, %v2550_v16  ;;  %v2839_v52 = vld [vmem:[#allocation2 + $0x68] sm:$0xff] }
 0x13f   : > { %v2558_v1 = vpop.permute.xlu1 %2557  ;;  %v2324_v15 = vunpack.i.l.bf16 %v3640_v32 }
 0x140   : > { %v2560_v50 = vunpack.i.h.bf16 %v2558_v1  ;;  %v2559_v18 = vunpack.i.l.bf16 %v2558_v1  ;;  %v1571_v24 = vsel %vm1548_vm10, %v1538_v0, %v2554_v48  ;;  %v1572_v30 = vsel %vm1548_vm10, %v1539_v42, %v2555_v21  ;;  %v2841_v1 = vld [vmem:[#allocation2 + $0x128] sm:$0xff] }
 0x141   : > { %v2563_v11 = vpop.permute.xlu0 %2562  ;;  %v1360_v21 = vsel %vm182_vm0, %v2839_v52, %v2205_v13  ;;  %v1359_v48 = vsel %vm182_vm0, %v2840_v3, %v2204_v31  ;;  %v1376_v19 = vsel %vm182_vm0, %v2841_v1, %v2245_v39  ;;  %v1408_v57 = vsel %vm1383_vm5, %v1375_v62, %v2324_v15 }
 0x142   : > { %v2565_v12 = vunpack.i.h.bf16 %v2563_v11  ;;  %v2564_v20 = vunpack.i.l.bf16 %v2563_v11  ;;  %v1555_v27 = vsel %vm1548_vm10, %v1522_v35, %v2559_v18  ;;  %v1556_v43 = vsel %vm1548_vm10, %v1523_v45, %v2560_v50 }
 0x143   : > { %v2568_v51 = vpop.permute.xlu1 %2567  ;;  %v1409_v38 = vsel %vm1383_vm5, %v1376_v19, %v2325_v44  ;;  %v1392_v18 = vsel %vm1383_vm5, %v1359_v48, %v2284_v6  ;;  %v1393_v11 = vsel %vm1383_vm5, %v1360_v21, %v2285_v17 }
 0x144   : > { %v1604_v33 = vsel %vm1581_vm12, %v1571_v24, %v2564_v20  ;;  %v1605_v60 = vsel %vm1581_vm12, %v1572_v30, %v2565_v12  ;;  %v2570_v14 = vunpack.i.h.bf16 %v2568_v51  ;;  %v2569_v56 = vunpack.i.l.bf16 %v2568_v51 }
 0x145   : > { %v2086_v5 = vpack.c.bf16 %v1605_v60, %v1604_v33  ;;  %v2573_v59 = vpop.permute.xlu0 %2572 }
 0x146   : > { %v1588_v36 = vsel %vm1581_vm12, %v1555_v27, %v2569_v56  ;;  %v1589_v54 = vsel %vm1581_vm12, %v1556_v43, %v2570_v14  ;;  %v2575_v41 = vunpack.i.h.bf16 %v2573_v59  ;;  %v2574_v25 = vunpack.i.l.bf16 %v2573_v59 }
 0x147   : > { %v2089_v8 = vpack.c.bf16 %v1589_v54, %v1588_v36  ;;  %2088 = vmatprep.subr.msk.bf16.mxu0 %vm3733_vm13, %v2086_v5  ;;  %2119 = vmatprep.subr.msk.bf16.mxu1 %vm3733_vm13, %v2086_v5  ;;  %v2578_v2 = vpop.permute.xlu1 %2577 }
 0x148   : > { %v2580_v32 = vunpack.i.h.bf16 %v2578_v2  ;;  %v2579_v37 = vunpack.i.l.bf16 %v2578_v2  ;;  %v1441_v0 = vsel %vm1416_vm6, %v1408_v57, %v2574_v25  ;;  %v1442_v42 = vsel %vm1416_vm6, %v1409_v38, %v2575_v41 }
 0x149   : > { %v2583_v53 = vpop.permute.xlu0 %2582  ;;  %2091 = vmatpush3.bf16.xpose.msk.msra.mxu0 %vm3733_vm13, %v2089_v8  ;;  %2127 = vmatpush3.bf16.xpose.msk.msra.mxu1 %vm3733_vm13, %v2089_v8 }
 0x14a   : > { %v2585_v4 = vunpack.i.h.bf16 %v2583_v53  ;;  %v2584_v50 = vunpack.i.l.bf16 %v2583_v53  ;;  %v1425_v30 = vsel %vm1416_vm6, %v1392_v18, %v2579_v37  ;;  %v1426_v51 = vsel %vm1416_vm6, %v1393_v11, %v2580_v32 }
 0x14b   : > { %v2588_v46 = vpop.permute.xlu1 %2587 }
 0x14c   : > { %v2590_v20 = vunpack.i.h.bf16 %v2588_v46  ;;  %v2589_v35 = vunpack.i.l.bf16 %v2588_v46  ;;  %v1474_v56 = vsel %vm1449_vm7, %v1441_v0, %v2584_v50  ;;  %v1475_v27 = vsel %vm1449_vm7, %v1442_v42, %v2585_v4 }
 0x14d   : > { %v2593_v63 = vpop.permute.xlu0 %2592  ;;  %v2210_v42 = vunpack.i.h.bf16 %v3544_v7 }
 0x14e   : > { %v2595_v45 = vunpack.i.h.bf16 %v2593_v63  ;;  %v2594_v24 = vunpack.i.l.bf16 %v2593_v63  ;;  %v1458_v53 = vsel %vm1449_vm7, %v1425_v30, %v2589_v35  ;;  %v1459_v46 = vsel %vm1449_vm7, %v1426_v51, %v2590_v20 }
 0x14f   : > { %v2598_v16 = vpop.permute.xlu1 %2597  ;;  %v2250_v20 = vunpack.i.h.bf16 %v3574_v26  ;;  %v2249_v35 = vunpack.i.l.bf16 %v3574_v26  ;;  %v2329_v30 = vunpack.i.l.bf16 %v3645_v58  ;;  %v2290_v51 = vunpack.i.h.bf16 %v3607_v47 }
 0x150   : > { %v2600_v33 = vunpack.i.h.bf16 %v2598_v16  ;;  %v2599_v60 = vunpack.i.l.bf16 %v2598_v16  ;;  %v1507_v13 = vsel %vm1482_vm8, %v1474_v56, %v2594_v24  ;;  %v1508_v31 = vsel %vm1482_vm8, %v1475_v27, %v2595_v45  ;;  %v2843_v27 = vld [vmem:[#allocation2 + $0x80] sm:$0xff] }
 0x151   : > { %v2603_v34 = vpop.permute.xlu0 %2602  ;;  %v2330_v24 = vunpack.i.h.bf16 %v3645_v58 }
 0x152   : > { %v2605_v43 = vunpack.i.h.bf16 %v2603_v34  ;;  %v2604_v5 = vunpack.i.l.bf16 %v2603_v34  ;;  %v1491_v39 = vsel %vm1482_vm8, %v1458_v53, %v2599_v60  ;;  %v1492_v9 = vsel %vm1482_vm8, %v1459_v46, %v2600_v33 }
 0x153   : > { %v2608_v12 = vpop.permute.xlu1 %2607  ;;  %v2289_v33 = vunpack.i.l.bf16 %v3607_v47 }
 0x154   : > { %v2610_v59 = vunpack.i.h.bf16 %v2608_v12  ;;  %v2609_v36 = vunpack.i.l.bf16 %v2608_v12  ;;  %v1540_v17 = vsel %vm1515_vm9, %v1507_v13, %v2604_v5  ;;  %v1541_v6 = vsel %vm1515_vm9, %v1508_v31, %v2605_v43 }
 0x155   : > { %v2613_v14 = vpop.permute.xlu0 %2612  ;;  %v2209_v12 = vunpack.i.l.bf16 %v3544_v7  ;;  %v1362_v43 = vsel %vm182_vm0, %v2843_v27, %v2210_v42  ;;  %v2844_v7 = vld [vmem:[#allocation2 + $0x78] sm:$0xff] }
 0x156   : > { %v2615_v54 = vunpack.i.h.bf16 %v2613_v14  ;;  %v2614_v8 = vunpack.i.l.bf16 %v2613_v14  ;;  %v1524_v16 = vsel %vm1515_vm9, %v1491_v39, %v2609_v36  ;;  %v1525_v52 = vsel %vm1515_vm9, %v1492_v9, %v2610_v59  ;;  %v2845_v59 = vld [vmem:[#allocation2 + $0x140] sm:$0xff]  ;;  %v2846_v36 = vld [vmem:[#allocation2 + $0x138] sm:$0xff] }
 0x157   : > { %v2618_v2 = vpop.permute.xlu1 %2617  ;;  %v1361_v5 = vsel %vm182_vm0, %v2844_v7, %v2209_v12  ;;  %v1378_v26 = vsel %vm182_vm0, %v2845_v59, %v2250_v20  ;;  %v1395_v31 = vsel %vm1383_vm5, %v1362_v43, %v2290_v51 }
 0x158   : > { %v2620_v63 = vunpack.i.h.bf16 %v2618_v2  ;;  %v2619_v44 = vunpack.i.l.bf16 %v2618_v2  ;;  %v1573_v21 = vsel %vm1548_vm10, %v1540_v17, %v2614_v8  ;;  %v1574_v3 = vsel %vm1548_vm10, %v1541_v6, %v2615_v54 }
 0x159   : > { %v2623_v15 = vpop.permute.xlu0 %2622  ;;  %v1377_v54 = vsel %vm182_vm0, %v2846_v36, %v2249_v35  ;;  %v1411_v47 = vsel %vm1383_vm5, %v1378_v26, %v2330_v24  ;;  %v1394_v39 = vsel %vm1383_vm5, %v1361_v5, %v2289_v33 }
 0x15a   : > { %v2625_v41 = vunpack.i.h.bf16 %v2623_v15  ;;  %v2624_v25 = vunpack.i.l.bf16 %v2623_v15  ;;  %v1557_v32 = vsel %vm1548_vm10, %v1524_v16, %v2619_v44  ;;  %v1558_v37 = vsel %vm1548_vm10, %v1525_v52, %v2620_v63 }
 0x15b   : > { %v2628_v48 = vpop.permute.xlu1 %2627  ;;  %v1410_v53 = vsel %vm1383_vm5, %v1377_v54, %v2329_v30 }
 0x15c   : > { %v1606_v1 = vsel %vm1581_vm12, %v1573_v21, %v2624_v25  ;;  %v1607_v19 = vsel %vm1581_vm12, %v1574_v3, %v2625_v41  ;;  %v2630_v61 = vunpack.i.h.bf16 %v2628_v48  ;;  %v2629_v62 = vunpack.i.l.bf16 %v2628_v48 }
 0x15d   : > { %v2092_v34 = vpack.c.bf16 %v1607_v19, %v1606_v1  ;;  %v2633_v57 = vpop.permute.xlu0 %2632 }
 0x15e   : > { %v1590_v38 = vsel %vm1581_vm12, %v1557_v32, %v2629_v62  ;;  %v1591_v4 = vsel %vm1581_vm12, %v1558_v37, %v2630_v61  ;;  %v2635_v60 = vunpack.i.h.bf16 %v2633_v57  ;;  %v2634_v14 = vunpack.i.l.bf16 %v2633_v57 }
 0x15f   : > { %v2095_v50 = vpack.c.bf16 %v1591_v4, %v1590_v38  ;;  %2094 = vmatprep.subr.msk.bf16.mxu0 %vm3733_vm13, %v2092_v34  ;;  %2120 = vmatprep.subr.msk.bf16.mxu1 %vm3733_vm13, %v2092_v34  ;;  %v2638_v18 = vpop.permute.xlu1 %2637 }
 0x160   : > { %v2640_v58 = vunpack.i.h.bf16 %v2638_v18  ;;  %v2639_v8 = vunpack.i.l.bf16 %v2638_v18  ;;  %v1444_v9 = vsel %vm1416_vm6, %v1411_v47, %v2635_v60  ;;  %v1443_v63 = vsel %vm1416_vm6, %v1410_v53, %v2634_v14 }
 0x161   : > { %v2643_v11 = vpop.permute.xlu0 %2642  ;;  %2097 = vmatpush3.bf16.xpose.msk.msra.mxu0 %vm3733_vm13, %v2095_v50  ;;  %2128 = vmatpush3.bf16.xpose.msk.msra.mxu1 %vm3733_vm13, %v2095_v50 }
 0x162   : > { %v2645_v46 = vunpack.i.h.bf16 %v2643_v11  ;;  %v2644_v13 = vunpack.i.l.bf16 %v2643_v11  ;;  %v1428_v25 = vsel %vm1416_vm6, %v1395_v31, %v2640_v58  ;;  %v1427_v16 = vsel %vm1416_vm6, %v1394_v39, %v2639_v8 }
 0x163   : > { %v2648_v0 = vpop.permute.xlu1 %2647  ;;  %v2215_v31 = vunpack.i.h.bf16 %v3546_v23  ;;  %v2214_v39 = vunpack.i.l.bf16 %v3546_v23 }
 0x164   : > { %v2650_v15 = vunpack.i.h.bf16 %v2648_v0  ;;  %v2649_v17 = vunpack.i.l.bf16 %v2648_v0  ;;  %v1476_v48 = vsel %vm1449_vm7, %v1443_v63, %v2644_v13  ;;  %v1477_v1 = vsel %vm1449_vm7, %v1444_v9, %v2645_v46 }
 0x165   : > { %v2653_v45 = vpop.permute.xlu0 %2652  ;;  %v2255_v9 = vunpack.i.h.bf16 %v3578_v10  ;;  %v2254_v63 = vunpack.i.l.bf16 %v3578_v10  ;;  %v2850_v10 = vld [vmem:[#allocation2 + $0x150] sm:$0xff] }
 0x166   : > { %v2655_v6 = vunpack.i.h.bf16 %v2653_v45  ;;  %v2654_v41 = vunpack.i.l.bf16 %v2653_v45  ;;  %v1460_v38 = vsel %vm1449_vm7, %v1427_v16, %v2649_v17  ;;  %v1461_v4 = vsel %vm1449_vm7, %v1428_v25, %v2650_v15 }
 0x167   : > { %v2658_v56 = vpop.permute.xlu1 %2657 }
 0x168   : > { %v2660_v52 = vunpack.i.h.bf16 %v2658_v56  ;;  %v2659_v21 = vunpack.i.l.bf16 %v2658_v56  ;;  %v1509_v50 = vsel %vm1482_vm8, %v1476_v48, %v2654_v41  ;;  %v1510_v18 = vsel %vm1482_vm8, %v1477_v1, %v2655_v6  ;;  %v2848_v48 = vld [vmem:[#allocation2 + $0x90] sm:$0xff]  ;;  %v2849_v1 = vld [vmem:[#allocation2 + $0x158] sm:$0xff] }
 0x169   : > { %v2663_v2 = vpop.permute.xlu0 %2662  ;;  %v2295_v6 = vunpack.i.h.bf16 %v3609_v55  ;;  %v2294_v41 = vunpack.i.l.bf16 %v3609_v55  ;;  %v1363_v23 = vsel %vm182_vm0, %v2848_v48, %v2214_v39 }
 0x16a   : > { %v2665_v19 = vunpack.i.h.bf16 %v2663_v2  ;;  %v2664_v61 = vunpack.i.l.bf16 %v2663_v2  ;;  %v1493_v11 = vsel %vm1482_vm8, %v1460_v38, %v2659_v21  ;;  %v1494_v0 = vsel %vm1482_vm8, %v1461_v4, %v2660_v52  ;;  %v2847_v21 = vld [vmem:[#allocation2 + $0x98] sm:$0xff] }
 0x16b   : > { %v2668_v44 = vpop.permute.xlu1 %2667  ;;  %v1396_v4 = vsel %vm1383_vm5, %v1363_v23, %v2294_v41 }
 0x16c   : > { %v2670_v62 = vunpack.i.h.bf16 %v2668_v44  ;;  %v2669_v32 = vunpack.i.l.bf16 %v2668_v44  ;;  %v1542_v35 = vsel %vm1515_vm9, %v1509_v50, %v2664_v61  ;;  %v1543_v45 = vsel %vm1515_vm9, %v1510_v18, %v2665_v19 }
 0x16d   : > { %v2673_v3 = vpop.permute.xlu0 %2672  ;;  %v1380_v19 = vsel %vm182_vm0, %v2849_v1, %v2255_v9  ;;  %v1379_v61 = vsel %vm182_vm0, %v2850_v10, %v2254_v63 }
 0x16e   : > { %v2675_v37 = vunpack.i.h.bf16 %v2673_v3  ;;  %v2674_v34 = vunpack.i.l.bf16 %v2673_v3  ;;  %v1526_v51 = vsel %vm1515_vm9, %v1493_v11, %v2669_v32  ;;  %v1527_v33 = vsel %vm1515_vm9, %v1494_v0, %v2670_v62 }
 0x16f   : > { %v2678_v57 = vpop.permute.xlu1 %2677  ;;  %v1364_v3 = vsel %vm182_vm0, %v2847_v21, %v2215_v31 }
 0x170   : > { %v2680_v42 = vunpack.i.h.bf16 %v2678_v57  ;;  %v2679_v12 = vunpack.i.l.bf16 %v2678_v57  ;;  %v1575_v60 = vsel %vm1548_vm10, %v1542_v35, %v2674_v34  ;;  %v1576_v14 = vsel %vm1548_vm10, %v1543_v45, %v2675_v37 }
 0x171   : > { %v2683_v20 = vpop.permute.xlu0 %2682  ;;  %v1397_v50 = vsel %vm1383_vm5, %v1364_v3, %v2295_v6 }
 0x172   : > { %v2685_v24 = vunpack.i.h.bf16 %v2683_v20  ;;  %v2684_v30 = vunpack.i.l.bf16 %v2683_v20  ;;  %v1559_v59 = vsel %vm1548_vm10, %v1526_v51, %v2679_v12  ;;  %v1560_v26 = vsel %vm1548_vm10, %v1527_v33, %v2680_v42 }
 0x173   : > { %v2688_v56 = vpop.permute.xlu1 %2687 }
 0x174   : > { %v1608_v27 = vsel %vm1581_vm12, %v1575_v60, %v2684_v30  ;;  %v1609_v43 = vsel %vm1581_vm12, %v1576_v14, %v2685_v24  ;;  %v2690_v7 = vunpack.i.h.bf16 %v2688_v56  ;;  %v2689_v5 = vunpack.i.l.bf16 %v2688_v56 }
 0x175   : > { %v2098_v36 = vpack.c.bf16 %v1609_v43, %v1608_v27  ;;  %v2693_v54 = vpop.permute.xlu0 %2692 }
 0x176   : > { %v1592_v58 = vsel %vm1581_vm12, %v1559_v59, %v2689_v5  ;;  %v1593_v8 = vsel %vm1581_vm12, %v1560_v26, %v2690_v7  ;;  %v2695_v15 = vunpack.i.h.bf16 %v2693_v54  ;;  %v2694_v17 = vunpack.i.l.bf16 %v2693_v54 }
 0x177   : > { %v2101_v2 = vpack.c.bf16 %v1593_v8, %v1592_v58  ;;  %2100 = vmatprep.subr.msk.bf16.mxu0 %vm3733_vm13, %v2098_v36  ;;  %2121 = vmatprep.subr.msk.bf16.mxu1 %vm3733_vm13, %v2098_v36  ;;  %v2698_v47 = vpop.permute.xlu1 %2697 }
 0x178   : > { %v2700_v25 = vunpack.i.h.bf16 %v2698_v47  ;;  %v2699_v16 = vunpack.i.l.bf16 %v2698_v47  ;;  %v1412_v55 = vsel %vm1383_vm5, %v1379_v61, %v2694_v17  ;;  %v1413_v34 = vsel %vm1383_vm5, %v1380_v19, %v2695_v15 }
 0x179   : > { %v2703_v53 = vpop.permute.xlu0 %2702  ;;  %2103 = vmatpush3.bf16.xpose.msk.msra.mxu0 %vm3733_vm13, %v2101_v2  ;;  %2129 = vmatpush3.bf16.xpose.msk.msra.mxu1 %vm3733_vm13, %v2101_v2 }
 0x17a   : > { %v2705_v62 = vunpack.i.h.bf16 %v2703_v53  ;;  %v2704_v32 = vunpack.i.l.bf16 %v2703_v53  ;;  %v1445_v18 = vsel %vm1416_vm6, %v1412_v55, %v2699_v16  ;;  %v1446_v11 = vsel %vm1416_vm6, %v1413_v34, %v2700_v25 }
 0x17b   : > { %v2708_v46 = vpop.permute.xlu1 %2707  ;;  %v2260_v55 = vunpack.i.h.bf16 %v3585_v22  ;;  %v2259_v34 = vunpack.i.l.bf16 %v3585_v22 }
 0x17c   : > { %v2710_v57 = vunpack.i.h.bf16 %v2708_v46  ;;  %v2709_v38 = vunpack.i.l.bf16 %v2708_v46  ;;  %v1429_v45 = vsel %vm1416_vm6, %v1396_v4, %v2704_v32  ;;  %v1430_v24 = vsel %vm1416_vm6, %v1397_v50, %v2705_v62 }
 0x17d   : > { %v2713_v13 = vpop.permute.xlu0 %2712 }
 0x17e   : > { %v2715_v42 = vunpack.i.h.bf16 %v2713_v13  ;;  %v2714_v12 = vunpack.i.l.bf16 %v2713_v13  ;;  %v1478_v60 = vsel %vm1449_vm7, %v1445_v18, %v2709_v38  ;;  %v1479_v14 = vsel %vm1449_vm7, %v1446_v11, %v2710_v57 }
 0x17f   : > { %v2718_v44 = vpop.permute.xlu1 %2717  ;;  %v2220_v18 = vunpack.i.h.bf16 %v3552_v49  ;;  %v2219_v11 = vunpack.i.l.bf16 %v3552_v49 }
 0x180   : > { %v2720_v20 = vunpack.i.h.bf16 %v2718_v44  ;;  %v2719_v35 = vunpack.i.l.bf16 %v2718_v44  ;;  %v1462_v36 = vsel %vm1449_vm7, %v1429_v45, %v2714_v12  ;;  %v1463_v54 = vsel %vm1449_vm7, %v1430_v24, %v2715_v42  ;;  %v2852_v12 = vld [vmem:[#allocation2 + $0x168] sm:$0xff] }
 0x181   : > { %v2723_v52 = vpop.permute.xlu0 %2722 }
 0x182   : > { %v2725_v30 = vunpack.i.h.bf16 %v2723_v52  ;;  %v2724_v51 = vunpack.i.l.bf16 %v2723_v52  ;;  %v1511_v58 = vsel %vm1482_vm8, %v1478_v60, %v2719_v35  ;;  %v1512_v8 = vsel %vm1482_vm8, %v1479_v14, %v2720_v20  ;;  %v4405_v35 = vld [vmem:[#allocation7_spill] sm:$0xff] }
 0x183   : > { %v2728_v37 = vpop.permute.xlu1 %2727  ;;  %v1381_v20 = vsel %vm182_vm0, %v2852_v12, %v2259_v34  ;;  %v2300_v45 = vunpack.i.h.bf16 %v4405_v35  ;;  %v2299_v24 = vunpack.i.l.bf16 %v4405_v35 }
 0x184   : > { %v2730_v56 = vunpack.i.h.bf16 %v2728_v37  ;;  %v2729_v27 = vunpack.i.l.bf16 %v2728_v37  ;;  %v1495_v2 = vsel %vm1482_vm8, %v1462_v36, %v2724_v51  ;;  %v1496_v47 = vsel %vm1482_vm8, %v1463_v54, %v2725_v30 }
 0x185   : > { %v2733_v0 = vpop.permute.xlu0 %2732 }
 0x186   : > { %v2735_v43 = vunpack.i.h.bf16 %v2733_v0  ;;  %v2734_v7 = vunpack.i.l.bf16 %v2733_v0  ;;  %v1544_v31 = vsel %vm1515_vm9, %v1511_v58, %v2729_v27  ;;  %v1545_v39 = vsel %vm1515_vm9, %v1512_v8, %v2730_v56  ;;  %v2851_v0 = vld [vmem:[#allocation2 + $0x170] sm:$0xff] }
 0x187   : > { %v2738_v33 = vpop.permute.xlu1 %2737  ;;  %v1382_v42 = vsel %vm182_vm0, %v2851_v0, %v2260_v55  ;;  %v2853_v27 = vld [vmem:[#allocation2 + $0xb0] sm:$0xff] }
 0x188   : > { %v2740_v5 = vunpack.i.h.bf16 %v2738_v33  ;;  %v2739_v59 = vunpack.i.l.bf16 %v2738_v33  ;;  %v1528_v44 = vsel %vm1515_vm9, %v1495_v2, %v2734_v7  ;;  %v1529_v15 = vsel %vm1515_vm9, %v1496_v47, %v2735_v43  ;;  %v2854_v7 = vld [vmem:[#allocation2 + $0xa8] sm:$0xff] }
 0x189   : > { %v2743_v26 = vpop.permute.xlu0 %2742  ;;  %v1366_v43 = vsel %vm182_vm0, %v2853_v27, %v2220_v18 }
 0x18a   : > { %v2745_v53 = vunpack.i.h.bf16 %v2743_v26  ;;  %v2744_v46 = vunpack.i.l.bf16 %v2743_v26  ;;  %v1577_v17 = vsel %vm1548_vm10, %v1544_v31, %v2739_v59  ;;  %v1578_v6 = vsel %vm1548_vm10, %v1545_v39, %v2740_v5 }
 0x18b   : > { %v2748_v13 = vpop.permute.xlu1 %2747  ;;  %v1365_v5 = vsel %vm182_vm0, %v2854_v7, %v2219_v11  ;;  %v1399_v36 = vsel %vm1383_vm5, %v1366_v43, %v2300_v45 }
 0x18c   : > { %v2750_v9 = vunpack.i.h.bf16 %v2748_v13  ;;  %v2749_v63 = vunpack.i.l.bf16 %v2748_v13  ;;  %v1561_v3 = vsel %vm1548_vm10, %v1528_v44, %v2744_v46  ;;  %v1562_v48 = vsel %vm1548_vm10, %v1529_v15, %v2745_v53 }
 0x18d   : > { %v2753_v41 = vpop.permute.xlu0 %2752  ;;  %v1398_v54 = vsel %vm1383_vm5, %v1365_v5, %v2299_v24 }
 0x18e   : > { %v1610_v25 = vsel %vm1581_vm12, %v1577_v17, %v2749_v63  ;;  %v1611_v16 = vsel %vm1581_vm12, %v1578_v6, %v2750_v9  ;;  %v2755_v52 = vunpack.i.h.bf16 %v2753_v41  ;;  %v2754_v21 = vunpack.i.l.bf16 %v2753_v41 }
 0x18f   : > { %v2104_v23 = vpack.c.bf16 %v1611_v16, %v1610_v25  ;;  %v2758_v1 = vpop.permute.xlu1 %2757 }
 0x190   : > { %v1594_v19 = vsel %vm1581_vm12, %v1561_v3, %v2754_v21  ;;  %v1595_v10 = vsel %vm1581_vm12, %v1562_v48, %v2755_v52  ;;  %v2760_v38 = vunpack.i.h.bf16 %v2758_v1  ;;  %v2759_v4 = vunpack.i.l.bf16 %v2758_v1 }
 0x191   : > { %v2107_v61 = vpack.c.bf16 %v1595_v10, %v1594_v19  ;;  %v2763_v62 = vpop.permute.xlu0 %2762  ;;  %2106 = vmatprep.subr.msk.bf16.mxu0 %vm3733_vm13, %v2104_v23  ;;  %2122 = vmatprep.subr.msk.bf16.mxu1 %vm3733_vm13, %v2104_v23 }
 0x192   : > { %v2765_v30 = vunpack.i.h.bf16 %v2763_v62  ;;  %v2764_v22 = vunpack.i.l.bf16 %v2763_v62  ;;  %v1415_v33 = vsel %vm1383_vm5, %v1382_v42, %v2760_v38  ;;  %v1414_v60 = vsel %vm1383_vm5, %v1381_v20, %v2759_v4 }
 0x193   : > { %2109 = vmatpush3.bf16.xpose.msk.msra.mxu0 %vm3733_vm13, %v2107_v61  ;;  %2130 = vmatpush3.bf16.xpose.msk.msra.mxu1 %vm3733_vm13, %v2107_v61  ;;  %v2768_v32 = vpop.permute.xlu1 %2767 }
 0x194   : > { %v2770_v14 = vunpack.i.h.bf16 %v2768_v32  ;;  %v2769_v56 = vunpack.i.l.bf16 %v2768_v32  ;;  %v1448_v58 = vsel %vm1416_vm6, %v1415_v33, %v2765_v30  ;;  %v1447_v8 = vsel %vm1416_vm6, %v1414_v60, %v2764_v22  ;;  %v1615_v60 = vld [vmem:[%s4340_s1 + $0x8] sm:$0xff] }
 0x195   : > { %v2773_v37 = vpop.permute.xlu0 %2772 }
 0x196   : > { %v2775_v59 = vunpack.i.h.bf16 %v2773_v37  ;;  %v2774_v26 = vunpack.i.l.bf16 %v2773_v37  ;;  %v1432_v31 = vsel %vm1416_vm6, %v1399_v36, %v2770_v14  ;;  %v1431_v39 = vsel %vm1416_vm6, %v1398_v54, %v2769_v56  ;;  %v1617_v14 = vld [vmem:[%s4340_s1 + $0x18] sm:$0xff] }
 0x197   : > { %v2778_v57 = vpop.permute.xlu1 %2777 }
 0x198   : > { %v2780_v47 = vunpack.i.h.bf16 %v2778_v57  ;;  %v2779_v53 = vunpack.i.l.bf16 %v2778_v57  ;;  %v1480_v15 = vsel %vm1449_vm7, %v1447_v8, %v2774_v26  ;;  %v1481_v17 = vsel %vm1449_vm7, %v1448_v58, %v2775_v59 }
 0x199   : > { %v2783_v50 = vpop.permute.xlu0 %2782 }
 0x19a   : > { %v2785_v46 = vunpack.i.h.bf16 %v2783_v50  ;;  %v2784_v13 = vunpack.i.l.bf16 %v2783_v50  ;;  %v1464_v48 = vsel %vm1449_vm7, %v1431_v39, %v2779_v53  ;;  %v1465_v23 = vsel %vm1449_vm7, %v1432_v31, %v2780_v47 }
 0x19b   : > { %v2788_v51 = vpop.permute.xlu1 %2787 }
 0x19c   : > { %v2790_v9 = vunpack.i.h.bf16 %v2788_v51  ;;  %v2789_v63 = vunpack.i.l.bf16 %v2788_v51  ;;  %v1513_v1 = vsel %vm1482_vm8, %v1480_v15, %v2784_v13  ;;  %v1514_v19 = vsel %vm1482_vm8, %v1481_v17, %v2785_v46 }
 0x19d   : > { %v2793_v49 = vpop.permute.xlu0 %2792 }
 0x19e   : > { %v2795_v6 = vunpack.i.h.bf16 %v2793_v49  ;;  %v2794_v41 = vunpack.i.l.bf16 %v2793_v49  ;;  %v1497_v10 = vsel %vm1482_vm8, %v1464_v48, %v2789_v63  ;;  %v1498_v61 = vsel %vm1482_vm8, %v1465_v23, %v2790_v9 }
 0x19f   : > { %v2798_v2 = vpop.permute.xlu1 %2797 }
 0x1a0   : > { %v2800_v25 = vunpack.i.h.bf16 %v2798_v2  ;;  %v2799_v16 = vunpack.i.l.bf16 %v2798_v2  ;;  %v1546_v55 = vsel %vm1515_vm9, %v1513_v1, %v2794_v41  ;;  %v1547_v34 = vsel %vm1515_vm9, %v1514_v19, %v2795_v6 }
 0x1a1   : > { %v2803_v44 = vpop.permute.xlu0 %2802 }
 0x1a2   : > { %v2805_v52 = vunpack.i.h.bf16 %v2803_v44  ;;  %v2804_v21 = vunpack.i.l.bf16 %v2803_v44  ;;  %v1530_v4 = vsel %vm1515_vm9, %v1497_v10, %v2799_v16  ;;  %v1531_v50 = vsel %vm1515_vm9, %v1498_v61, %v2800_v25 }
 0x1a3   : > { %v2808_v3 = vpop.permute.xlu1 %2807 }
 0x1a4   : > { %v2810_v62 = vunpack.i.h.bf16 %v2808_v3  ;;  %v2809_v32 = vunpack.i.l.bf16 %v2808_v3  ;;  %v1579_v18 = vsel %vm1548_vm10, %v1546_v55, %v2804_v21  ;;  %v1580_v11 = vsel %vm1548_vm10, %v1547_v34, %v2805_v52 }
 0x1a5   : > { %v2813_v37 = vpop.permute.xlu0 %2812 }
 0x1a6   : > { %v2815_v57 = vunpack.i.h.bf16 %v2813_v37  ;;  %v2814_v38 = vunpack.i.l.bf16 %v2813_v37  ;;  %v1563_v45 = vsel %vm1548_vm10, %v1530_v4, %v2809_v32  ;;  %v1564_v24 = vsel %vm1548_vm10, %v1531_v50, %v2810_v62 }
 0x1a7   : > { %v2818_v0 = vpop.permute.xlu1 %2817 }
 0x1a8   : > { %v1612_v42 = vsel %vm1581_vm12, %v1579_v18, %v2814_v38  ;;  %v1613_v12 = vsel %vm1581_vm12, %v1580_v11, %v2815_v57  ;;  %v2820_v20 = vunpack.i.h.bf16 %v2818_v0  ;;  %v2819_v35 = vunpack.i.l.bf16 %v2818_v0 }
 0x1a9   : > { %v2110_v30 = vpack.c.bf16 %v1613_v12, %v1612_v42 }
 0x1aa   : > { %v1596_v22 = vsel %vm1581_vm12, %v1563_v45, %v2819_v35  ;;  %v1597_v51 = vsel %vm1581_vm12, %v1564_v24, %v2820_v20 }
 0x1ab   : > { %v2113_v33 = vpack.c.bf16 %v1597_v51, %v1596_v22  ;;  %2112 = vmatprep.subr.msk.bf16.mxu0 %vm3733_vm13, %v2110_v30  ;;  %2123 = vmatprep.subr.msk.bf16.mxu1 %vm3733_vm13, %v2110_v30 }
 0x1ad   : > { %2115 = vmatpush3.bf16.xpose.msk.msra.mxu0 %vm3733_vm13, %v2113_v33  ;;  %2131 = vmatpush3.bf16.xpose.msk.msra.mxu1 %vm3733_vm13, %v2113_v33 }
 0x1b4   : > { %2061 = vmatmul.mubr.msk.f32.vlgmr.msra.gmra.mrb[0].mxu0 %vm1618_vm11, %v3983_v40  ;;  %2065 = vmatmul.mubr.msk.f32.vlgmr.msra.gmra.mrb[0].mxu1 %vm1618_vm11, %v4011_v28 }
 0x1b5   : > { %2062 = vmatprep.mubr.msk.f32.mxu0 %vm1618_vm11, %v1615_v60  ;;  %2066 = vmatprep.mubr.msk.f32.mxu1 %vm1618_vm11, %v1617_v14 }
 0x1b8   : > { %2063 = vmatmul.mubr.msk.f32.gmra.mrb[2].mxu0 %vm1618_vm11, %v1615_v60  ;;  %2067 = vmatmul.mubr.msk.f32.gmra.mrb[2].mxu1 %vm1618_vm11, %v1617_v14 }
 0x287   : > { %v1793_v29 = vpop.f32.mrb[0].mxu0  ;;  %v1805_v56 = vpop.f32.mrb[0].mxu1 }
 0x288   : > { %1816 = vst [vmem:[%s4268_s30] sm:$0xff] %v1793_v29  ;;  %v1836_v40 = vmul.f32 %v1793_v29, %v1793_v29  ;;  %v1795_v28 = vpop.f32.mrb[1].mxu0  ;;  %1820 = vst [vmem:[%s4268_s30 + $0x20] sm:$0xff] %v1805_v56  ;;  %v1840_v49 = vmul.f32 %v1805_v56, %v1805_v56  ;;  %v1807_v27 = vpop.f32.mrb[1].mxu1 }
 0x289   : > { %1817 = vst [vmem:[%s4268_s30 + $0x8] sm:$0xff] %v1795_v28  ;;  %v1824_v43 = vadd.f32 %v1795_v28, %v1793_v29  ;;  %v1837_v7 = vmul.f32 %v1795_v28, %v1795_v28  ;;  %1821 = vst [vmem:[%s4268_s30 + $0x28] sm:$0xff] %v1807_v27  ;;  %v1830_v5 = vadd.f32 %v1807_v27, %v1805_v56 }
 0x28a   : > { %v1841_v59 = vmul.f32 %v1807_v27, %v1807_v27 }
 0x28b   : > { %1825 = vadd.xlane.f32.xlu0 %v1824_v43  ;;  %v1844_v26 = vadd.f32 %v1837_v7, %v1836_v40  ;;  %v1799_v36 = vpop.f32.mrb[2].mxu0  ;;  %v1811_v54 = vpop.f32.mrb[2].mxu1 }
 0x28c   : > { %v1850_v58 = vadd.f32 %v1841_v59, %v1840_v49  ;;  %1818 = vst [vmem:[%s4268_s30 + $0x10] sm:$0xff] %v1799_v36  ;;  %v1838_v8 = vmul.f32 %v1799_v36, %v1799_v36  ;;  %v1801_v2 = vpop.f32.mrb[3].mxu0  ;;  %1822 = vst [vmem:[%s4268_s30 + $0x30] sm:$0xff] %v1811_v54  ;;  %v1842_v47 = vmul.f32 %v1811_v54, %v1811_v54  ;;  %v1813_v53 = vpop.f32.mrb[3].mxu1 }
 0x28d   : > { %1845 = vadd.xlane.f32.xlu1 %v1844_v26  ;;  %1819 = vst [vmem:[%s4268_s30 + $0x18] sm:$0xff] %v1801_v2  ;;  %v1827_v46 = vadd.f32 %v1801_v2, %v1799_v36  ;;  %v1839_v13 = vmul.f32 %v1801_v2, %v1801_v2  ;;  %1823 = vst [vmem:[%s4268_s30 + $0x38] sm:$0xff] %v1813_v53  ;;  %v1833_v31 = vadd.f32 %v1813_v53, %v1811_v54 }
 0x28e   : > { %v1843_v39 = vmul.f32 %v1813_v53, %v1813_v53 }
 0x28f   : > { %v1847_v9 = vadd.f32 %v1839_v13, %v1838_v8  ;;  %1831 = vadd.xlane.f32.xlu0 %v1830_v5 }
 0x290   : > { %v1853_v63 = vadd.f32 %v1843_v39, %v1842_v47 }
 0x291   : > { %1828 = vadd.xlane.f32.xlu1 %v1827_v46 }
 0x293   : > { %1834 = vadd.xlane.f32.xlu0 %v1833_v31 }
 0x295   : > { %1851 = vadd.xlane.f32.xlu1 %v1850_v58 }
 0x297   : > { %1848 = vadd.xlane.f32.xlu0 %v1847_v9 }
 0x29b   : > { %1854 = vadd.xlane.f32.xlu0 %v1853_v63 }
 0x29c   : > { %2868 = shalt.err (!%p2865_p3)
}
 0x29d   : > { %s2869_s20 = scalar_lea.hbm %s4283_s9, 1024  ;;  %s2873_s27 = scalar_lea.hbm %s4341_s2, 2048 }
 0x29e   : > { %p2870_p4 = scmp.ne.s32.totalorder %s4283_s9, %s2869_s20  ;;  %p2874_p9 = scmp.lt.u32.totalorder %s4283_s9, %s4341_s2 }
 0x29f   : > { %p2875_p10 = scmp.lt.u32.totalorder %s2873_s27, %s2869_s20  ;;  %p2877_p12 = scmp.lt.u32.totalorder %s2869_s20, %s4283_s9 }
 0x2a0   : > { %p2871_p7 = pnand %p2870_p4, %p2988_p5 }
 0x2a1   : > { %p2876_p11 = por %p2875_p10, %p2874_p9 }
 0x2a2   : > { %p2872_p8 = pneg %p2871_p7 }
 0x2a3   : > { %p2878_p13 = por %p2877_p12, %p2876_p11 }
 0x2a5   : > { %p2879_p0 = pnand %p2878_p13, %p2872_p8 }
 0x2a7   : > { %2882 = shalt.err (!%p2879_p0)
}
 0x2a8   : > { %s2929_s30 = smov 256   ;;  %s2026_s4 = sshll.u32 %s3041_s24, 5  ;;  %vm1856_vm14 = vcmask 7168   ;;  %vm1861_vm15 = vcmask 15360  }
 0x2a9   : > { %2132 = dma.vmem_to_hbm [thread:$0]  (%p2988_p5), %s4285_s6, 1024, %s4283_s9, %s4289_s10, %s2929_s30, %s2929_s30, %s2923_s5  }
 0x2aa   : > { %s181_s11 = scalar_lea.vmem %s4342_s3, %s2026_s4 }
 0x318   : > { %v1826_v44 = vpop.xlane.xlu0 %1825 }
 0x31a   : > { %v1846_v15 = vpop.xlane.xlu1 %1845 }
 0x31b   : > { %v1857_v17 = vsel %vm1856_vm14, %v1826_v44, %v1846_v15 }
 0x31c   : > { %1862 = vst.msk [vmem:[%s181_s11] sm:$0xff] %vm1861_vm15, %v1857_v17  ;;  %v1832_v6 = vpop.xlane.xlu0 %1831 }
 0x31e   : > { %v1829_v41 = vpop.xlane.xlu1 %1828 }
 0x320   : > { %v1835_v25 = vpop.xlane.xlu0 %1834 }
 0x322   : > { %v1852_v16 = vpop.xlane.xlu1 %1851 }
 0x323   : > { %v1859_v52 = vsel %vm1856_vm14, %v1832_v6, %v1852_v16 }
 0x324   : > { %1864 = vst.msk [vmem:[%s181_s11 + $0x10] sm:$0xff] %vm1861_vm15, %v1859_v52  ;;  %v1849_v21 = vpop.xlane.xlu0 %1848 }
 0x325   : > { %v1858_v3 = vsel %vm1856_vm14, %v1829_v41, %v1849_v21 }
 0x326   : > { %1863 = vst.msk [vmem:[%s181_s11 + $0x8] sm:$0xff] %vm1861_vm15, %v1858_v3 }
 0x328   : > { %v1855_v48 = vpop.xlane.xlu0 %1854 }
 0x329   : > { %v1860_v23 = vsel %vm1856_vm14, %v1835_v25, %v1855_v48 }
 0x32a   : > { %1865 = vst.msk [vmem:[%s181_s11 + $0x18] sm:$0xff] %vm1861_vm15, %v1860_v23 }
 0x32b PF: > { %p2138_p5 = scmp.ge.s32.totalorder %s2917_s15, 2  ;;  %s1903_s22 = sand.u32 1, %s2905_s12  }
 0x32c   : > { %s1904_s24 = scalar_lea.sflag [#allocation4], %s1903_s22 }
 0x32d   : > { %p2135_p1 = pnand %p2138_p5, %p2992_p6 }
 0x32f   : > { %2900 = dma.done.wait (!%p2135_p1), %s1904_s24, 1024  }
 0x330   : > { %2902 = vsyncadd (!%p2135_p1), %s1904_s24, 4294966272  ;;  %p14_p2 = scmp.ge.s32.totalorder %s2975_s18, 4   ;;  %s4406_s12 = smov %s2909_s13 }
 0x331   : > { %s4407_s13 = smov %s2913_s14  ;;  %s4408_s14 = smov %s2986_s21 }
 0x332   : > { %s4409_s15 = smov %s2975_s18  ;;  %16 = sbr.rel (!%p14_p2) target bundleno = 3 (0x3), region = 77 }
 0x339   :  { %1917 = vsyncpa [#allocation4], 1 }
 0x33a   :  { %1919 = vsyncpa [#allocation4 + $0x1], 1 }

</bundles_post_ra>
